<compile_context>
chip_gen: v5e
topology: v5e:2x2
jax: 0.10.0
libtpu: 0.0.40
codegen_flags: <defaults>
</compile_context>

<pallas_src>
import functools

import jax
import jax.numpy as jnp
import numpy as np
from jax.experimental import pallas as pl
from jax.experimental.pallas import tpu as pltpu


def _round8(n):
    return (n + 7) // 8 * 8


# ----------------------------------------------------------------------------
# Fused kernel: multi-layer LSTM recurrence + linear head, all VMEM-resident.
# Gate column order inside the kernel is [i, f, o, g] (reordered by wrapper).
# refs = [x (T,B,Dp), slab (R,4H), out (B,O)]
# ----------------------------------------------------------------------------
def fused_lstm_kernel(x_ref, slab_ref, out_ref, *, num_layers, H, O, layout,
                      mxu_dtype):
    T, B, Dp = x_ref.shape
    H4 = 4 * H
    f32 = jnp.float32

    def rows(name, n):
        off = layout[name]                     # static, 8-aligned row offset
        return slab_ref[off:off + n, :]

    # ---- Load weights once; cast MXU operands once (f32 exact / bf16 fast).
    wih0 = rows("wih0", Dp).astype(mxu_dtype)                 # (Dp, 4H)
    whh0 = rows("whh0", H).astype(mxu_dtype)                  # (H, 4H)
    b0 = rows("b0", 1)                                        # (1, 4H) f32
    w_up, b_up = [], []
    for l in range(1, num_layers):
        w_up.append(rows(f"w{l}", 2 * H).astype(mxu_dtype))   # (2H, 4H)
        b_up.append(jnp.broadcast_to(rows(f"b{l}", 1), (B, H4)))  # hoisted
    wo = rows("wo", H).astype(mxu_dtype)                      # (H, 4H) padded
    bo = rows("bo", 1)                                        # (1, 4H) padded

    # ---- Hoisted time-major layer-0 input projection: one bulk MXU pass.
    x = x_ref[...].reshape(T * B, Dp).astype(mxu_dtype)
    xg0 = (jnp.dot(x, wih0, preferred_element_type=f32) + b0).reshape(T, B, H4)

    h = [jnp.zeros((B, H), f32) for _ in range(num_layers)]
    c = [jnp.zeros((B, H), f32) for _ in range(num_layers)]

    def cell(gates, c_prev):
        # One wide sigmoid (i, f, o) + one tanh (g): 2 EUP pushes per cell.
        s = jax.nn.sigmoid(gates[:, :3 * H])
        g = jnp.tanh(gates[:, 3 * H:])
        i_g, f_g, o_g = s[:, :H], s[:, H:2 * H], s[:, 2 * H:]
        c_new = f_g * c_prev + i_g * g
        h_new = o_g * jnp.tanh(c_new)
        return h_new, c_new

    # ---- Statically unrolled recurrence (single basic block -> LLO overlap).
    for t in range(T):
        gates = xg0[t] + jnp.dot(h[0].astype(mxu_dtype), whh0,
                                 preferred_element_type=f32)
        h[0], c[0] = cell(gates, c[0])
        for l in range(1, num_layers):
            # Single fused dot over the concatenated K axis: [h_{l-1}, h_l].
            hcat = jnp.concatenate([h[l - 1], h[l]], axis=1).astype(mxu_dtype)
            gates = jnp.dot(hcat, w_up[l - 1],
                            preferred_element_type=f32) + b_up[l - 1]
            h[l], c[l] = cell(gates, c[l])

    # ---- Fused linear head on the final top-layer hidden state.
    out = jnp.dot(h[-1].astype(mxu_dtype), wo, preferred_element_type=f32) + bo
    out_ref[...] = out[:, :O].astype(out_ref.dtype)


# ----------------------------------------------------------------------------
# Wrapper-side packing: gate-column reorder + one contiguous weight slab.
# ----------------------------------------------------------------------------
def _reorder_gate_cols(w, H):
    """Permute gate columns [i f g o] (PyTorch order) -> [i f o g] (kernel)."""
    return jnp.concatenate([w[:, :2 * H], w[:, 3 * H:], w[:, 2 * H:3 * H]],
                           axis=1)


def _pack_params(params, Dp):
    """Pack LSTM weights/biases + linear head into one (R, 4H) f32 slab.

    Row sections are 8-sublane aligned so every in-kernel view is a static,
    aligned slice. The head (wo, bo) is zero-padded to 4H columns.
    Returns (slab, layout) where layout maps section name -> row offset.
    """
    H = params["lstm"][0]["whh"].shape[0]
    H4 = 4 * H
    O = params["wo"].shape[1]

    blocks, layout = [], {}
    state = {"off": 0}

    def add(name, block, pad_to=None):
        rows = _round8(block.shape[0] if pad_to is None else pad_to)
        layout[name] = state["off"]
        blocks.append(jnp.pad(block.astype(jnp.float32),
                              ((0, rows - block.shape[0]), (0, 0))))
        state["off"] += rows

    l0 = params["lstm"][0]
    add("wih0", _reorder_gate_cols(l0["wih"], H), pad_to=Dp)
    add("whh0", _reorder_gate_cols(l0["whh"], H))
    add("b0", _reorder_gate_cols(l0["b"], H))
    for l in range(1, len(params["lstm"])):
        lay = params["lstm"][l]
        w_cat = jnp.concatenate([lay["wih"], lay["whh"]], axis=0)   # (2H, 4H)
        add(f"w{l}", _reorder_gate_cols(w_cat, H))
        add(f"b{l}", _reorder_gate_cols(lay["b"], H))
    add("wo", jnp.pad(params["wo"], ((0, 0), (0, H4 - O))))
    add("bo", jnp.pad(params["bo"].reshape(1, O), ((0, 0), (0, H4 - O))))
    return jnp.concatenate(blocks, axis=0), layout


def lstm_model_forward(x, params, *, mxu_dtype=jnp.float32):
    """x: (B, T, input_dim) -> (B, output_dim); matches LSTMModel.forward.

    mxu_dtype=jnp.bfloat16 shortens the serial MXU chain (single pass per dot,
    best on v6e/v7x) at ~1e-2 accuracy; the f32 default keeps 1e-5 fidelity.
    """
    num_layers = len(params["lstm"])
    H = params["lstm"][0]["whh"].shape[0]
    D = params["lstm"][0]["wih"].shape[0]
    O = params["wo"].shape[1]
    B, T, _ = x.shape
    Dp = _round8(D)

    # Time-major input; feature dim zero-padded to a sublane multiple (free).
    xk = jnp.transpose(x.astype(jnp.float32), (1, 0, 2))
    xk = jnp.pad(xk, ((0, 0), (0, 0), (0, Dp - D)))

    slab, layout = _pack_params(params, Dp)

    kernel = functools.partial(
        fused_lstm_kernel, num_layers=num_layers, H=H, O=O, layout=layout,
        mxu_dtype=mxu_dtype)

    return pl.pallas_call(
        kernel,
        out_shape=jax.ShapeDtypeStruct((B, O), jnp.float32),
        grid_spec=pltpu.PrefetchScalarGridSpec(
            num_scalar_prefetch=0,
            grid=(1,),
            in_specs=[
                pl.BlockSpec(xk.shape, lambda i: (0, 0, 0)),
                pl.BlockSpec(slab.shape, lambda i: (0, 0)),
            ],
            out_specs=pl.BlockSpec((B, O), lambda i: (0, 0)),
        ),
        compiler_params=pltpu.CompilerParams(
            dimension_semantics=("arbitrary",)),
    )(xk, slab)


# ----------------------------------------------------------------------------
# Parameter init (PyTorch-style uniform init; b = b_ih + b_hh combined).
# Gate order in params is the PyTorch order [i, f, g, o]; the wrapper reorders.
# ----------------------------------------------------------------------------
def init_params(key, input_dim, hidden_dim, num_layers, output_dim):
    params = {"lstm": []}
    k = 1.0 / np.sqrt(hidden_dim)
    for layer in range(num_layers):
        d_in = input_dim if layer == 0 else hidden_dim
        key, k1, k2, k3, k4 = jax.random.split(key, 5)
        wih = jax.random.uniform(k1, (d_in, 4 * hidden_dim), jnp.float32, -k, k)
        whh = jax.random.uniform(k2, (hidden_dim, 4 * hidden_dim), jnp.float32, -k, k)
        b_ih = jax.random.uniform(k3, (4 * hidden_dim,), jnp.float32, -k, k)
        b_hh = jax.random.uniform(k4, (4 * hidden_dim,), jnp.float32, -k, k)
        params["lstm"].append(
            {"wih": wih, "whh": whh, "b": (b_ih + b_hh).reshape(1, 4 * hidden_dim)}
        )
    key, k5, k6 = jax.random.split(key, 3)
    params["wo"] = jax.random.uniform(k5, (hidden_dim, output_dim), jnp.float32, -k, k)
    params["bo"] = jax.random.uniform(k6, (output_dim,), jnp.float32, -k, k)
    return params


# ----------------------------------------------------------------------------
# Pure-JAX reference (PyTorch gate order / semantics) for a sanity check.
# ----------------------------------------------------------------------------
def reference_forward(x, params):
    B = x.shape[0]
    h_seq = jnp.transpose(x, (1, 0, 2)).astype(jnp.float32)  # (T, B, D)
    for layer in params["lstm"]:
        H = layer["whh"].shape[0]

        def step(carry, x_t, layer=layer, H=H):
            h, c = carry
            gates = x_t @ layer["wih"] + h @ layer["whh"] + layer["b"]
            i = jax.nn.sigmoid(gates[:, 0 * H:1 * H])
            f = jax.nn.sigmoid(gates[:, 1 * H:2 * H])
            g = jnp.tanh(gates[:, 2 * H:3 * H])
            o = jax.nn.sigmoid(gates[:, 3 * H:4 * H])
            c = f * c + i * g
            h = o * jnp.tanh(c)
            return (h, c), h

        init = (jnp.zeros((B, H), jnp.float32), jnp.zeros((B, H), jnp.float32))
        _, h_seq = jax.lax.scan(step, init, h_seq)
    return h_seq[-1] @ params["wo"] + params["bo"]


if __name__ == "__main__":
    # LSTMModel(input_dim=4, hidden_dim=32, num_layers=2, output_dim=4)
    B, T, INPUT_DIM, HIDDEN_DIM, NUM_LAYERS, OUTPUT_DIM = 2, 8, 4, 32, 2, 4

    key = jax.random.PRNGKey(0)
    key, kx = jax.random.split(key)
    x = jax.random.normal(kx, (B, T, INPUT_DIM), jnp.float32)
    params = init_params(key, INPUT_DIM, HIDDEN_DIM, NUM_LAYERS, OUTPUT_DIM)

    ref = jax.block_until_ready(reference_forward(x, params))

    # Exact path (f32 MXU operands): matches reference to 1e-5.
    out = jax.block_until_ready(lstm_model_forward(x, params))
    assert out.shape == (B, OUTPUT_DIM)
    np.testing.assert_allclose(np.asarray(out), np.asarray(ref),
                               rtol=1e-5, atol=1e-5)

    # Fast path for v6e/v7x (bf16 MXU operands, f32 VPU/EUP math): loose tol.
    out_bf16 = jax.block_until_ready(
        lstm_model_forward(x, params, mxu_dtype=jnp.bfloat16))
    np.testing.assert_allclose(np.asarray(out_bf16), np.asarray(ref),
                               rtol=5e-2, atol=5e-2)

    print("KERNEL_OK")
</pallas_src>

<mosaic_0001>
module attributes {stable_mosaic.version = 11 : i64} {
  func.func @fused_lstm_kernel(%arg0: i32, %arg1: memref<8x2x8xf32, #tpu.memory_space<vmem>>, %arg2: memref<160x128xf32, #tpu.memory_space<vmem>>, %arg3: memref<2x4xf32, #tpu.memory_space<vmem>>) attributes {dimension_semantics = [#tpu.dimension_semantics<arbitrary>], iteration_bounds = array<i64: 1>, scalar_prefetch = 0 : i64, scratch_operands = 0 : i64, tpu.core_type = #tpu.core_type<tc>, window_params = [{pipeline_mode = #tpu.pipeline_mode<synchronous>, transform_indices = @transform_0, window_bounds = array<i64: 8, 2, 8>}, {pipeline_mode = #tpu.pipeline_mode<synchronous>, transform_indices = @transform_1, window_bounds = array<i64: 160, 128>}, {pipeline_mode = #tpu.pipeline_mode<synchronous>, transform_indices = @transform_2, window_bounds = array<i64: 2, 4>}]} {
    %c0 = arith.constant 0 : index
    %c0_0 = arith.constant 0 : index
    %0 = vector.load %arg2[%c0, %c0_0] : memref<160x128xf32, #tpu.memory_space<vmem>>, vector<8x128xf32>
    %c8 = arith.constant 8 : index
    %c0_1 = arith.constant 0 : index
    %1 = vector.load %arg2[%c8, %c0_1] : memref<160x128xf32, #tpu.memory_space<vmem>>, vector<32x128xf32>
    %c40 = arith.constant 40 : index
    %c0_2 = arith.constant 0 : index
    %2 = vector.load %arg2[%c40, %c0_2] : memref<160x128xf32, #tpu.memory_space<vmem>>, vector<1x128xf32>
    %c48 = arith.constant 48 : index
    %c0_3 = arith.constant 0 : index
    %3 = vector.load %arg2[%c48, %c0_3] : memref<160x128xf32, #tpu.memory_space<vmem>>, vector<64x128xf32>
    %c112 = arith.constant 112 : index
    %c0_4 = arith.constant 0 : index
    %4 = vector.load %arg2[%c112, %c0_4] : memref<160x128xf32, #tpu.memory_space<vmem>>, vector<1x128xf32>
    %5 = vector.shape_cast %4 : vector<1x128xf32> to vector<1x128xf32>
    %6 = vector.broadcast %5 : vector<1x128xf32> to vector<2x128xf32>
    %c120 = arith.constant 120 : index
    %c0_5 = arith.constant 0 : index
    %7 = vector.load %arg2[%c120, %c0_5] : memref<160x128xf32, #tpu.memory_space<vmem>>, vector<32x128xf32>
    %c152 = arith.constant 152 : index
    %c0_6 = arith.constant 0 : index
    %8 = vector.load %arg2[%c152, %c0_6] : memref<160x128xf32, #tpu.memory_space<vmem>>, vector<1x128xf32>
    %c0_7 = arith.constant 0 : index
    %c0_8 = arith.constant 0 : index
    %c0_9 = arith.constant 0 : index
    %9 = vector.load %arg1[%c0_7, %c0_8, %c0_9] : memref<8x2x8xf32, #tpu.memory_space<vmem>>, vector<8x2x8xf32>
    %10 = vector.shape_cast %9 : vector<8x2x8xf32> to vector<16x8xf32>
    %cst = arith.constant dense<0.000000e+00> : vector<16x128xf32>
    %11 = tpu.matmul %10, %0, %cst {dimension_numbers = #tpu.dot_dimension_numbers<[1], [0], [0], [1], [0, 0, 1, 1], [], []>} : vector<16x8xf32>, vector<8x128xf32>, vector<16x128xf32> -> vector<16x128xf32>
    %12 = vector.broadcast %2 : vector<1x128xf32> to vector<16x128xf32>
    %13 = arith.addf %11, %12 : vector<16x128xf32>
    %14 = vector.shape_cast %13 : vector<16x128xf32> to vector<8x2x128xf32>
    %cst_10 = arith.constant 0.000000e+00 : f32
    %15 = vector.broadcast %cst_10 : f32 to vector<2x32xf32>
    %cst_11 = arith.constant 0.000000e+00 : f32
    %16 = vector.broadcast %cst_11 : f32 to vector<2x32xf32>
    %cst_12 = arith.constant 0.000000e+00 : f32
    %17 = vector.broadcast %cst_12 : f32 to vector<2x32xf32>
    %cst_13 = arith.constant 0.000000e+00 : f32
    %18 = vector.broadcast %cst_13 : f32 to vector<2x32xf32>
    %19 = vector.extract_strided_slice %14 {offsets = [0, 0, 0], sizes = [1, 2, 128], strides = [1, 1, 1]} : vector<8x2x128xf32> to vector<1x2x128xf32>
    %20 = vector.shape_cast %19 : vector<1x2x128xf32> to vector<2x128xf32>
    %cst_14 = arith.constant dense<0.000000e+00> : vector<2x128xf32>
    %21 = tpu.matmul %15, %1, %cst_14 {dimension_numbers = #tpu.dot_dimension_numbers<[1], [0], [0], [1], [0, 0, 1, 1], [], []>} : vector<2x32xf32>, vector<32x128xf32>, vector<2x128xf32> -> vector<2x128xf32>
    %22 = arith.addf %20, %21 : vector<2x128xf32>
    %23 = vector.extract_strided_slice %22 {offsets = [0, 0], sizes = [2, 96], strides = [1, 1]} : vector<2x128xf32> to vector<2x96xf32>
    %24 = arith.negf %23 : vector<2x96xf32>
    %25 = math.exp %24 : vector<2x96xf32>
    %cst_15 = arith.constant 1.000000e+00 : f32
    %26 = vector.broadcast %cst_15 : f32 to vector<2x96xf32>
    %27 = arith.addf %26, %25 : vector<2x96xf32>
    %28 = arith.divf %26, %27 : vector<2x96xf32>
    %29 = vector.extract_strided_slice %22 {offsets = [0, 96], sizes = [2, 32], strides = [1, 1]} : vector<2x128xf32> to vector<2x32xf32>
    %30 = math.tanh %29 : vector<2x32xf32>
    %31 = vector.extract_strided_slice %28 {offsets = [0, 0], sizes = [2, 32], strides = [1, 1]} : vector<2x96xf32> to vector<2x32xf32>
    %32 = vector.extract_strided_slice %28 {offsets = [0, 32], sizes = [2, 32], strides = [1, 1]} : vector<2x96xf32> to vector<2x32xf32>
    %33 = vector.extract_strided_slice %28 {offsets = [0, 64], sizes = [2, 32], strides = [1, 1]} : vector<2x96xf32> to vector<2x32xf32>
    %34 = arith.mulf %32, %17 : vector<2x32xf32>
    %35 = arith.mulf %31, %30 : vector<2x32xf32>
    %36 = arith.addf %34, %35 : vector<2x32xf32>
    %37 = math.tanh %36 : vector<2x32xf32>
    %38 = arith.mulf %33, %37 : vector<2x32xf32>
    %39 = tpu.concatenate %38, %16 in 1 : vector<2x32xf32>, vector<2x32xf32> -> vector<2x64xf32>
    %cst_16 = arith.constant dense<0.000000e+00> : vector<2x128xf32>
    %40 = tpu.matmul %39, %3, %cst_16 {dimension_numbers = #tpu.dot_dimension_numbers<[1], [0], [0], [1], [0, 0, 1, 1], [], []>} : vector<2x64xf32>, vector<64x128xf32>, vector<2x128xf32> -> vector<2x128xf32>
    %41 = arith.addf %40, %6 : vector<2x128xf32>
    %42 = vector.extract_strided_slice %41 {offsets = [0, 0], sizes = [2, 96], strides = [1, 1]} : vector<2x128xf32> to vector<2x96xf32>
    %43 = arith.negf %42 : vector<2x96xf32>
    %44 = math.exp %43 : vector<2x96xf32>
    %cst_17 = arith.constant 1.000000e+00 : f32
    %45 = vector.broadcast %cst_17 : f32 to vector<2x96xf32>
    %46 = arith.addf %45, %44 : vector<2x96xf32>
    %47 = arith.divf %45, %46 : vector<2x96xf32>
    %48 = vector.extract_strided_slice %41 {offsets = [0, 96], sizes = [2, 32], strides = [1, 1]} : vector<2x128xf32> to vector<2x32xf32>
    %49 = math.tanh %48 : vector<2x32xf32>
    %50 = vector.extract_strided_slice %47 {offsets = [0, 0], sizes = [2, 32], strides = [1, 1]} : vector<2x96xf32> to vector<2x32xf32>
    %51 = vector.extract_strided_slice %47 {offsets = [0, 32], sizes = [2, 32], strides = [1, 1]} : vector<2x96xf32> to vector<2x32xf32>
    %52 = vector.extract_strided_slice %47 {offsets = [0, 64], sizes = [2, 32], strides = [1, 1]} : vector<2x96xf32> to vector<2x32xf32>
    %53 = arith.mulf %51, %18 : vector<2x32xf32>
    %54 = arith.mulf %50, %49 : vector<2x32xf32>
    %55 = arith.addf %53, %54 : vector<2x32xf32>
    %56 = math.tanh %55 : vector<2x32xf32>
    %57 = arith.mulf %52, %56 : vector<2x32xf32>
    %58 = vector.extract_strided_slice %14 {offsets = [1, 0, 0], sizes = [1, 2, 128], strides = [1, 1, 1]} : vector<8x2x128xf32> to vector<1x2x128xf32>
    %59 = vector.shape_cast %58 : vector<1x2x128xf32> to vector<2x128xf32>
    %cst_18 = arith.constant dense<0.000000e+00> : vector<2x128xf32>
    %60 = tpu.matmul %38, %1, %cst_18 {dimension_numbers = #tpu.dot_dimension_numbers<[1], [0], [0], [1], [0, 0, 1, 1], [], []>} : vector<2x32xf32>, vector<32x128xf32>, vector<2x128xf32> -> vector<2x128xf32>
    %61 = arith.addf %59, %60 : vector<2x128xf32>
    %62 = vector.extract_strided_slice %61 {offsets = [0, 0], sizes = [2, 96], strides = [1, 1]} : vector<2x128xf32> to vector<2x96xf32>
    %63 = arith.negf %62 : vector<2x96xf32>
    %64 = math.exp %63 : vector<2x96xf32>
    %cst_19 = arith.constant 1.000000e+00 : f32
    %65 = vector.broadcast %cst_19 : f32 to vector<2x96xf32>
    %66 = arith.addf %65, %64 : vector<2x96xf32>
    %67 = arith.divf %65, %66 : vector<2x96xf32>
    %68 = vector.extract_strided_slice %61 {offsets = [0, 96], sizes = [2, 32], strides = [1, 1]} : vector<2x128xf32> to vector<2x32xf32>
    %69 = math.tanh %68 : vector<2x32xf32>
    %70 = vector.extract_strided_slice %67 {offsets = [0, 0], sizes = [2, 32], strides = [1, 1]} : vector<2x96xf32> to vector<2x32xf32>
    %71 = vector.extract_strided_slice %67 {offsets = [0, 32], sizes = [2, 32], strides = [1, 1]} : vector<2x96xf32> to vector<2x32xf32>
    %72 = vector.extract_strided_slice %67 {offsets = [0, 64], sizes = [2, 32], strides = [1, 1]} : vector<2x96xf32> to vector<2x32xf32>
    %73 = arith.mulf %71, %36 : vector<2x32xf32>
    %74 = arith.mulf %70, %69 : vector<2x32xf32>
    %75 = arith.addf %73, %74 : vector<2x32xf32>
    %76 = math.tanh %75 : vector<2x32xf32>
    %77 = arith.mulf %72, %76 : vector<2x32xf32>
    %78 = tpu.concatenate %77, %57 in 1 : vector<2x32xf32>, vector<2x32xf32> -> vector<2x64xf32>
    %cst_20 = arith.constant dense<0.000000e+00> : vector<2x128xf32>
    %79 = tpu.matmul %78, %3, %cst_20 {dimension_numbers = #tpu.dot_dimension_numbers<[1], [0], [0], [1], [0, 0, 1, 1], [], []>} : vector<2x64xf32>, vector<64x128xf32>, vector<2x128xf32> -> vector<2x128xf32>
    %80 = arith.addf %79, %6 : vector<2x128xf32>
    %81 = vector.extract_strided_slice %80 {offsets = [0, 0], sizes = [2, 96], strides = [1, 1]} : vector<2x128xf32> to vector<2x96xf32>
    %82 = arith.negf %81 : vector<2x96xf32>
    %83 = math.exp %82 : vector<2x96xf32>
    %cst_21 = arith.constant 1.000000e+00 : f32
    %84 = vector.broadcast %cst_21 : f32 to vector<2x96xf32>
    %85 = arith.addf %84, %83 : vector<2x96xf32>
    %86 = arith.divf %84, %85 : vector<2x96xf32>
    %87 = vector.extract_strided_slice %80 {offsets = [0, 96], sizes = [2, 32], strides = [1, 1]} : vector<2x128xf32> to vector<2x32xf32>
    %88 = math.tanh %87 : vector<2x32xf32>
    %89 = vector.extract_strided_slice %86 {offsets = [0, 0], sizes = [2, 32], strides = [1, 1]} : vector<2x96xf32> to vector<2x32xf32>
    %90 = vector.extract_strided_slice %86 {offsets = [0, 32], sizes = [2, 32], strides = [1, 1]} : vector<2x96xf32> to vector<2x32xf32>
    %91 = vector.extract_strided_slice %86 {offsets = [0, 64], sizes = [2, 32], strides = [1, 1]} : vector<2x96xf32> to vector<2x32xf32>
    %92 = arith.mulf %90, %55 : vector<2x32xf32>
    %93 = arith.mulf %89, %88 : vector<2x32xf32>
    %94 = arith.addf %92, %93 : vector<2x32xf32>
    %95 = math.tanh %94 : vector<2x32xf32>
    %96 = arith.mulf %91, %95 : vector<2x32xf32>
    %97 = vector.extract_strided_slice %14 {offsets = [2, 0, 0], sizes = [1, 2, 128], strides = [1, 1, 1]} : vector<8x2x128xf32> to vector<1x2x128xf32>
    %98 = vector.shape_cast %97 : vector<1x2x128xf32> to vector<2x128xf32>
    %cst_22 = arith.constant dense<0.000000e+00> : vector<2x128xf32>
    %99 = tpu.matmul %77, %1, %cst_22 {dimension_numbers = #tpu.dot_dimension_numbers<[1], [0], [0], [1], [0, 0, 1, 1], [], []>} : vector<2x32xf32>, vector<32x128xf32>, vector<2x128xf32> -> vector<2x128xf32>
    %100 = arith.addf %98, %99 : vector<2x128xf32>
    %101 = vector.extract_strided_slice %100 {offsets = [0, 0], sizes = [2, 96], strides = [1, 1]} : vector<2x128xf32> to vector<2x96xf32>
    %102 = arith.negf %101 : vector<2x96xf32>
    %103 = math.exp %102 : vector<2x96xf32>
    %cst_23 = arith.constant 1.000000e+00 : f32
    %104 = vector.broadcast %cst_23 : f32 to vector<2x96xf32>
    %105 = arith.addf %104, %103 : vector<2x96xf32>
    %106 = arith.divf %104, %105 : vector<2x96xf32>
    %107 = vector.extract_strided_slice %100 {offsets = [0, 96], sizes = [2, 32], strides = [1, 1]} : vector<2x128xf32> to vector<2x32xf32>
    %108 = math.tanh %107 : vector<2x32xf32>
    %109 = vector.extract_strided_slice %106 {offsets = [0, 0], sizes = [2, 32], strides = [1, 1]} : vector<2x96xf32> to vector<2x32xf32>
    %110 = vector.extract_strided_slice %106 {offsets = [0, 32], sizes = [2, 32], strides = [1, 1]} : vector<2x96xf32> to vector<2x32xf32>
    %111 = vector.extract_strided_slice %106 {offsets = [0, 64], sizes = [2, 32], strides = [1, 1]} : vector<2x96xf32> to vector<2x32xf32>
    %112 = arith.mulf %110, %75 : vector<2x32xf32>
    %113 = arith.mulf %109, %108 : vector<2x32xf32>
    %114 = arith.addf %112, %113 : vector<2x32xf32>
    %115 = math.tanh %114 : vector<2x32xf32>
    %116 = arith.mulf %111, %115 : vector<2x32xf32>
    %117 = tpu.concatenate %116, %96 in 1 : vector<2x32xf32>, vector<2x32xf32> -> vector<2x64xf32>
    %cst_24 = arith.constant dense<0.000000e+00> : vector<2x128xf32>
    %118 = tpu.matmul %117, %3, %cst_24 {dimension_numbers = #tpu.dot_dimension_numbers<[1], [0], [0], [1], [0, 0, 1, 1], [], []>} : vector<2x64xf32>, vector<64x128xf32>, vector<2x128xf32> -> vector<2x128xf32>
    %119 = arith.addf %118, %6 : vector<2x128xf32>
    %120 = vector.extract_strided_slice %119 {offsets = [0, 0], sizes = [2, 96], strides = [1, 1]} : vector<2x128xf32> to vector<2x96xf32>
    %121 = arith.negf %120 : vector<2x96xf32>
    %122 = math.exp %121 : vector<2x96xf32>
    %cst_25 = arith.constant 1.000000e+00 : f32
    %123 = vector.broadcast %cst_25 : f32 to vector<2x96xf32>
    %124 = arith.addf %123, %122 : vector<2x96xf32>
    %125 = arith.divf %123, %124 : vector<2x96xf32>
    %126 = vector.extract_strided_slice %119 {offsets = [0, 96], sizes = [2, 32], strides = [1, 1]} : vector<2x128xf32> to vector<2x32xf32>
    %127 = math.tanh %126 : vector<2x32xf32>
    %128 = vector.extract_strided_slice %125 {offsets = [0, 0], sizes = [2, 32], strides = [1, 1]} : vector<2x96xf32> to vector<2x32xf32>
    %129 = vector.extract_strided_slice %125 {offsets = [0, 32], sizes = [2, 32], strides = [1, 1]} : vector<2x96xf32> to vector<2x32xf32>
    %130 = vector.extract_strided_slice %125 {offsets = [0, 64], sizes = [2, 32], strides = [1, 1]} : vector<2x96xf32> to vector<2x32xf32>
    %131 = arith.mulf %129, %94 : vector<2x32xf32>
    %132 = arith.mulf %128, %127 : vector<2x32xf32>
    %133 = arith.addf %131, %132 : vector<2x32xf32>
    %134 = math.tanh %133 : vector<2x32xf32>
    %135 = arith.mulf %130, %134 : vector<2x32xf32>
    %136 = vector.extract_strided_slice %14 {offsets = [3, 0, 0], sizes = [1, 2, 128], strides = [1, 1, 1]} : vector<8x2x128xf32> to vector<1x2x128xf32>
    %137 = vector.shape_cast %136 : vector<1x2x128xf32> to vector<2x128xf32>
    %cst_26 = arith.constant dense<0.000000e+00> : vector<2x128xf32>
    %138 = tpu.matmul %116, %1, %cst_26 {dimension_numbers = #tpu.dot_dimension_numbers<[1], [0], [0], [1], [0, 0, 1, 1], [], []>} : vector<2x32xf32>, vector<32x128xf32>, vector<2x128xf32> -> vector<2x128xf32>
    %139 = arith.addf %137, %138 : vector<2x128xf32>
    %140 = vector.extract_strided_slice %139 {offsets = [0, 0], sizes = [2, 96], strides = [1, 1]} : vector<2x128xf32> to vector<2x96xf32>
    %141 = arith.negf %140 : vector<2x96xf32>
    %142 = math.exp %141 : vector<2x96xf32>
    %cst_27 = arith.constant 1.000000e+00 : f32
    %143 = vector.broadcast %cst_27 : f32 to vector<2x96xf32>
    %144 = arith.addf %143, %142 : vector<2x96xf32>
    %145 = arith.divf %143, %144 : vector<2x96xf32>
    %146 = vector.extract_strided_slice %139 {offsets = [0, 96], sizes = [2, 32], strides = [1, 1]} : vector<2x128xf32> to vector<2x32xf32>
    %147 = math.tanh %146 : vector<2x32xf32>
    %148 = vector.extract_strided_slice %145 {offsets = [0, 0], sizes = [2, 32], strides = [1, 1]} : vector<2x96xf32> to vector<2x32xf32>
    %149 = vector.extract_strided_slice %145 {offsets = [0, 32], sizes = [2, 32], strides = [1, 1]} : vector<2x96xf32> to vector<2x32xf32>
    %150 = vector.extract_strided_slice %145 {offsets = [0, 64], sizes = [2, 32], strides = [1, 1]} : vector<2x96xf32> to vector<2x32xf32>
    %151 = arith.mulf %149, %114 : vector<2x32xf32>
    %152 = arith.mulf %148, %147 : vector<2x32xf32>
    %153 = arith.addf %151, %152 : vector<2x32xf32>
    %154 = math.tanh %153 : vector<2x32xf32>
    %155 = arith.mulf %150, %154 : vector<2x32xf32>
    %156 = tpu.concatenate %155, %135 in 1 : vector<2x32xf32>, vector<2x32xf32> -> vector<2x64xf32>
    %cst_28 = arith.constant dense<0.000000e+00> : vector<2x128xf32>
    %157 = tpu.matmul %156, %3, %cst_28 {dimension_numbers = #tpu.dot_dimension_numbers<[1], [0], [0], [1], [0, 0, 1, 1], [], []>} : vector<2x64xf32>, vector<64x128xf32>, vector<2x128xf32> -> vector<2x128xf32>
    %158 = arith.addf %157, %6 : vector<2x128xf32>
    %159 = vector.extract_strided_slice %158 {offsets = [0, 0], sizes = [2, 96], strides = [1, 1]} : vector<2x128xf32> to vector<2x96xf32>
    %160 = arith.negf %159 : vector<2x96xf32>
    %161 = math.exp %160 : vector<2x96xf32>
    %cst_29 = arith.constant 1.000000e+00 : f32
    %162 = vector.broadcast %cst_29 : f32 to vector<2x96xf32>
    %163 = arith.addf %162, %161 : vector<2x96xf32>
    %164 = arith.divf %162, %163 : vector<2x96xf32>
    %165 = vector.extract_strided_slice %158 {offsets = [0, 96], sizes = [2, 32], strides = [1, 1]} : vector<2x128xf32> to vector<2x32xf32>
    %166 = math.tanh %165 : vector<2x32xf32>
    %167 = vector.extract_strided_slice %164 {offsets = [0, 0], sizes = [2, 32], strides = [1, 1]} : vector<2x96xf32> to vector<2x32xf32>
    %168 = vector.extract_strided_slice %164 {offsets = [0, 32], sizes = [2, 32], strides = [1, 1]} : vector<2x96xf32> to vector<2x32xf32>
    %169 = vector.extract_strided_slice %164 {offsets = [0, 64], sizes = [2, 32], strides = [1, 1]} : vector<2x96xf32> to vector<2x32xf32>
    %170 = arith.mulf %168, %133 : vector<2x32xf32>
    %171 = arith.mulf %167, %166 : vector<2x32xf32>
    %172 = arith.addf %170, %171 : vector<2x32xf32>
    %173 = math.tanh %172 : vector<2x32xf32>
    %174 = arith.mulf %169, %173 : vector<2x32xf32>
    %175 = vector.extract_strided_slice %14 {offsets = [4, 0, 0], sizes = [1, 2, 128], strides = [1, 1, 1]} : vector<8x2x128xf32> to vector<1x2x128xf32>
    %176 = vector.shape_cast %175 : vector<1x2x128xf32> to vector<2x128xf32>
    %cst_30 = arith.constant dense<0.000000e+00> : vector<2x128xf32>
    %177 = tpu.matmul %155, %1, %cst_30 {dimension_numbers = #tpu.dot_dimension_numbers<[1], [0], [0], [1], [0, 0, 1, 1], [], []>} : vector<2x32xf32>, vector<32x128xf32>, vector<2x128xf32> -> vector<2x128xf32>
    %178 = arith.addf %176, %177 : vector<2x128xf32>
    %179 = vector.extract_strided_slice %178 {offsets = [0, 0], sizes = [2, 96], strides = [1, 1]} : vector<2x128xf32> to vector<2x96xf32>
    %180 = arith.negf %179 : vector<2x96xf32>
    %181 = math.exp %180 : vector<2x96xf32>
    %cst_31 = arith.constant 1.000000e+00 : f32
    %182 = vector.broadcast %cst_31 : f32 to vector<2x96xf32>
    %183 = arith.addf %182, %181 : vector<2x96xf32>
    %184 = arith.divf %182, %183 : vector<2x96xf32>
    %185 = vector.extract_strided_slice %178 {offsets = [0, 96], sizes = [2, 32], strides = [1, 1]} : vector<2x128xf32> to vector<2x32xf32>
    %186 = math.tanh %185 : vector<2x32xf32>
    %187 = vector.extract_strided_slice %184 {offsets = [0, 0], sizes = [2, 32], strides = [1, 1]} : vector<2x96xf32> to vector<2x32xf32>
    %188 = vector.extract_strided_slice %184 {offsets = [0, 32], sizes = [2, 32], strides = [1, 1]} : vector<2x96xf32> to vector<2x32xf32>
    %189 = vector.extract_strided_slice %184 {offsets = [0, 64], sizes = [2, 32], strides = [1, 1]} : vector<2x96xf32> to vector<2x32xf32>
    %190 = arith.mulf %188, %153 : vector<2x32xf32>
    %191 = arith.mulf %187, %186 : vector<2x32xf32>
    %192 = arith.addf %190, %191 : vector<2x32xf32>
    %193 = math.tanh %192 : vector<2x32xf32>
    %194 = arith.mulf %189, %193 : vector<2x32xf32>
    %195 = tpu.concatenate %194, %174 in 1 : vector<2x32xf32>, vector<2x32xf32> -> vector<2x64xf32>
    %cst_32 = arith.constant dense<0.000000e+00> : vector<2x128xf32>
    %196 = tpu.matmul %195, %3, %cst_32 {dimension_numbers = #tpu.dot_dimension_numbers<[1], [0], [0], [1], [0, 0, 1, 1], [], []>} : vector<2x64xf32>, vector<64x128xf32>, vector<2x128xf32> -> vector<2x128xf32>
    %197 = arith.addf %196, %6 : vector<2x128xf32>
    %198 = vector.extract_strided_slice %197 {offsets = [0, 0], sizes = [2, 96], strides = [1, 1]} : vector<2x128xf32> to vector<2x96xf32>
    %199 = arith.negf %198 : vector<2x96xf32>
    %200 = math.exp %199 : vector<2x96xf32>
    %cst_33 = arith.constant 1.000000e+00 : f32
    %201 = vector.broadcast %cst_33 : f32 to vector<2x96xf32>
    %202 = arith.addf %201, %200 : vector<2x96xf32>
    %203 = arith.divf %201, %202 : vector<2x96xf32>
    %204 = vector.extract_strided_slice %197 {offsets = [0, 96], sizes = [2, 32], strides = [1, 1]} : vector<2x128xf32> to vector<2x32xf32>
    %205 = math.tanh %204 : vector<2x32xf32>
    %206 = vector.extract_strided_slice %203 {offsets = [0, 0], sizes = [2, 32], strides = [1, 1]} : vector<2x96xf32> to vector<2x32xf32>
    %207 = vector.extract_strided_slice %203 {offsets = [0, 32], sizes = [2, 32], strides = [1, 1]} : vector<2x96xf32> to vector<2x32xf32>
    %208 = vector.extract_strided_slice %203 {offsets = [0, 64], sizes = [2, 32], strides = [1, 1]} : vector<2x96xf32> to vector<2x32xf32>
    %209 = arith.mulf %207, %172 : vector<2x32xf32>
    %210 = arith.mulf %206, %205 : vector<2x32xf32>
    %211 = arith.addf %209, %210 : vector<2x32xf32>
    %212 = math.tanh %211 : vector<2x32xf32>
    %213 = arith.mulf %208, %212 : vector<2x32xf32>
    %214 = vector.extract_strided_slice %14 {offsets = [5, 0, 0], sizes = [1, 2, 128], strides = [1, 1, 1]} : vector<8x2x128xf32> to vector<1x2x128xf32>
    %215 = vector.shape_cast %214 : vector<1x2x128xf32> to vector<2x128xf32>
    %cst_34 = arith.constant dense<0.000000e+00> : vector<2x128xf32>
    %216 = tpu.matmul %194, %1, %cst_34 {dimension_numbers = #tpu.dot_dimension_numbers<[1], [0], [0], [1], [0, 0, 1, 1], [], []>} : vector<2x32xf32>, vector<32x128xf32>, vector<2x128xf32> -> vector<2x128xf32>
    %217 = arith.addf %215, %216 : vector<2x128xf32>
    %218 = vector.extract_strided_slice %217 {offsets = [0, 0], sizes = [2, 96], strides = [1, 1]} : vector<2x128xf32> to vector<2x96xf32>
    %219 = arith.negf %218 : vector<2x96xf32>
    %220 = math.exp %219 : vector<2x96xf32>
    %cst_35 = arith.constant 1.000000e+00 : f32
    %221 = vector.broadcast %cst_35 : f32 to vector<2x96xf32>
    %222 = arith.addf %221, %220 : vector<2x96xf32>
    %223 = arith.divf %221, %222 : vector<2x96xf32>
    %224 = vector.extract_strided_slice %217 {offsets = [0, 96], sizes = [2, 32], strides = [1, 1]} : vector<2x128xf32> to vector<2x32xf32>
    %225 = math.tanh %224 : vector<2x32xf32>
    %226 = vector.extract_strided_slice %223 {offsets = [0, 0], sizes = [2, 32], strides = [1, 1]} : vector<2x96xf32> to vector<2x32xf32>
    %227 = vector.extract_strided_slice %223 {offsets = [0, 32], sizes = [2, 32], strides = [1, 1]} : vector<2x96xf32> to vector<2x32xf32>
    %228 = vector.extract_strided_slice %223 {offsets = [0, 64], sizes = [2, 32], strides = [1, 1]} : vector<2x96xf32> to vector<2x32xf32>
    %229 = arith.mulf %227, %192 : vector<2x32xf32>
    %230 = arith.mulf %226, %225 : vector<2x32xf32>
    %231 = arith.addf %229, %230 : vector<2x32xf32>
    %232 = math.tanh %231 : vector<2x32xf32>
    %233 = arith.mulf %228, %232 : vector<2x32xf32>
    %234 = tpu.concatenate %233, %213 in 1 : vector<2x32xf32>, vector<2x32xf32> -> vector<2x64xf32>
    %cst_36 = arith.constant dense<0.000000e+00> : vector<2x128xf32>
    %235 = tpu.matmul %234, %3, %cst_36 {dimension_numbers = #tpu.dot_dimension_numbers<[1], [0], [0], [1], [0, 0, 1, 1], [], []>} : vector<2x64xf32>, vector<64x128xf32>, vector<2x128xf32> -> vector<2x128xf32>
    %236 = arith.addf %235, %6 : vector<2x128xf32>
    %237 = vector.extract_strided_slice %236 {offsets = [0, 0], sizes = [2, 96], strides = [1, 1]} : vector<2x128xf32> to vector<2x96xf32>
    %238 = arith.negf %237 : vector<2x96xf32>
    %239 = math.exp %238 : vector<2x96xf32>
    %cst_37 = arith.constant 1.000000e+00 : f32
    %240 = vector.broadcast %cst_37 : f32 to vector<2x96xf32>
    %241 = arith.addf %240, %239 : vector<2x96xf32>
    %242 = arith.divf %240, %241 : vector<2x96xf32>
    %243 = vector.extract_strided_slice %236 {offsets = [0, 96], sizes = [2, 32], strides = [1, 1]} : vector<2x128xf32> to vector<2x32xf32>
    %244 = math.tanh %243 : vector<2x32xf32>
    %245 = vector.extract_strided_slice %242 {offsets = [0, 0], sizes = [2, 32], strides = [1, 1]} : vector<2x96xf32> to vector<2x32xf32>
    %246 = vector.extract_strided_slice %242 {offsets = [0, 32], sizes = [2, 32], strides = [1, 1]} : vector<2x96xf32> to vector<2x32xf32>
    %247 = vector.extract_strided_slice %242 {offsets = [0, 64], sizes = [2, 32], strides = [1, 1]} : vector<2x96xf32> to vector<2x32xf32>
    %248 = arith.mulf %246, %211 : vector<2x32xf32>
    %249 = arith.mulf %245, %244 : vector<2x32xf32>
    %250 = arith.addf %248, %249 : vector<2x32xf32>
    %251 = math.tanh %250 : vector<2x32xf32>
    %252 = arith.mulf %247, %251 : vector<2x32xf32>
    %253 = vector.extract_strided_slice %14 {offsets = [6, 0, 0], sizes = [1, 2, 128], strides = [1, 1, 1]} : vector<8x2x128xf32> to vector<1x2x128xf32>
    %254 = vector.shape_cast %253 : vector<1x2x128xf32> to vector<2x128xf32>
    %cst_38 = arith.constant dense<0.000000e+00> : vector<2x128xf32>
    %255 = tpu.matmul %233, %1, %cst_38 {dimension_numbers = #tpu.dot_dimension_numbers<[1], [0], [0], [1], [0, 0, 1, 1], [], []>} : vector<2x32xf32>, vector<32x128xf32>, vector<2x128xf32> -> vector<2x128xf32>
    %256 = arith.addf %254, %255 : vector<2x128xf32>
    %257 = vector.extract_strided_slice %256 {offsets = [0, 0], sizes = [2, 96], strides = [1, 1]} : vector<2x128xf32> to vector<2x96xf32>
    %258 = arith.negf %257 : vector<2x96xf32>
    %259 = math.exp %258 : vector<2x96xf32>
    %cst_39 = arith.constant 1.000000e+00 : f32
    %260 = vector.broadcast %cst_39 : f32 to vector<2x96xf32>
    %261 = arith.addf %260, %259 : vector<2x96xf32>
    %262 = arith.divf %260, %261 : vector<2x96xf32>
    %263 = vector.extract_strided_slice %256 {offsets = [0, 96], sizes = [2, 32], strides = [1, 1]} : vector<2x128xf32> to vector<2x32xf32>
    %264 = math.tanh %263 : vector<2x32xf32>
    %265 = vector.extract_strided_slice %262 {offsets = [0, 0], sizes = [2, 32], strides = [1, 1]} : vector<2x96xf32> to vector<2x32xf32>
    %266 = vector.extract_strided_slice %262 {offsets = [0, 32], sizes = [2, 32], strides = [1, 1]} : vector<2x96xf32> to vector<2x32xf32>
    %267 = vector.extract_strided_slice %262 {offsets = [0, 64], sizes = [2, 32], strides = [1, 1]} : vector<2x96xf32> to vector<2x32xf32>
    %268 = arith.mulf %266, %231 : vector<2x32xf32>
    %269 = arith.mulf %265, %264 : vector<2x32xf32>
    %270 = arith.addf %268, %269 : vector<2x32xf32>
    %271 = math.tanh %270 : vector<2x32xf32>
    %272 = arith.mulf %267, %271 : vector<2x32xf32>
    %273 = tpu.concatenate %272, %252 in 1 : vector<2x32xf32>, vector<2x32xf32> -> vector<2x64xf32>
    %cst_40 = arith.constant dense<0.000000e+00> : vector<2x128xf32>
    %274 = tpu.matmul %273, %3, %cst_40 {dimension_numbers = #tpu.dot_dimension_numbers<[1], [0], [0], [1], [0, 0, 1, 1], [], []>} : vector<2x64xf32>, vector<64x128xf32>, vector<2x128xf32> -> vector<2x128xf32>
    %275 = arith.addf %274, %6 : vector<2x128xf32>
    %276 = vector.extract_strided_slice %275 {offsets = [0, 0], sizes = [2, 96], strides = [1, 1]} : vector<2x128xf32> to vector<2x96xf32>
    %277 = arith.negf %276 : vector<2x96xf32>
    %278 = math.exp %277 : vector<2x96xf32>
    %cst_41 = arith.constant 1.000000e+00 : f32
    %279 = vector.broadcast %cst_41 : f32 to vector<2x96xf32>
    %280 = arith.addf %279, %278 : vector<2x96xf32>
    %281 = arith.divf %279, %280 : vector<2x96xf32>
    %282 = vector.extract_strided_slice %275 {offsets = [0, 96], sizes = [2, 32], strides = [1, 1]} : vector<2x128xf32> to vector<2x32xf32>
    %283 = math.tanh %282 : vector<2x32xf32>
    %284 = vector.extract_strided_slice %281 {offsets = [0, 0], sizes = [2, 32], strides = [1, 1]} : vector<2x96xf32> to vector<2x32xf32>
    %285 = vector.extract_strided_slice %281 {offsets = [0, 32], sizes = [2, 32], strides = [1, 1]} : vector<2x96xf32> to vector<2x32xf32>
    %286 = vector.extract_strided_slice %281 {offsets = [0, 64], sizes = [2, 32], strides = [1, 1]} : vector<2x96xf32> to vector<2x32xf32>
    %287 = arith.mulf %285, %250 : vector<2x32xf32>
    %288 = arith.mulf %284, %283 : vector<2x32xf32>
    %289 = arith.addf %287, %288 : vector<2x32xf32>
    %290 = math.tanh %289 : vector<2x32xf32>
    %291 = arith.mulf %286, %290 : vector<2x32xf32>
    %292 = vector.extract_strided_slice %14 {offsets = [7, 0, 0], sizes = [1, 2, 128], strides = [1, 1, 1]} : vector<8x2x128xf32> to vector<1x2x128xf32>
    %293 = vector.shape_cast %292 : vector<1x2x128xf32> to vector<2x128xf32>
    %cst_42 = arith.constant dense<0.000000e+00> : vector<2x128xf32>
    %294 = tpu.matmul %272, %1, %cst_42 {dimension_numbers = #tpu.dot_dimension_numbers<[1], [0], [0], [1], [0, 0, 1, 1], [], []>} : vector<2x32xf32>, vector<32x128xf32>, vector<2x128xf32> -> vector<2x128xf32>
    %295 = arith.addf %293, %294 : vector<2x128xf32>
    %296 = vector.extract_strided_slice %295 {offsets = [0, 0], sizes = [2, 96], strides = [1, 1]} : vector<2x128xf32> to vector<2x96xf32>
    %297 = arith.negf %296 : vector<2x96xf32>
    %298 = math.exp %297 : vector<2x96xf32>
    %cst_43 = arith.constant 1.000000e+00 : f32
    %299 = vector.broadcast %cst_43 : f32 to vector<2x96xf32>
    %300 = arith.addf %299, %298 : vector<2x96xf32>
    %301 = arith.divf %299, %300 : vector<2x96xf32>
    %302 = vector.extract_strided_slice %295 {offsets = [0, 96], sizes = [2, 32], strides = [1, 1]} : vector<2x128xf32> to vector<2x32xf32>
    %303 = math.tanh %302 : vector<2x32xf32>
    %304 = vector.extract_strided_slice %301 {offsets = [0, 0], sizes = [2, 32], strides = [1, 1]} : vector<2x96xf32> to vector<2x32xf32>
    %305 = vector.extract_strided_slice %301 {offsets = [0, 32], sizes = [2, 32], strides = [1, 1]} : vector<2x96xf32> to vector<2x32xf32>
    %306 = vector.extract_strided_slice %301 {offsets = [0, 64], sizes = [2, 32], strides = [1, 1]} : vector<2x96xf32> to vector<2x32xf32>
    %307 = arith.mulf %305, %270 : vector<2x32xf32>
    %308 = arith.mulf %304, %303 : vector<2x32xf32>
    %309 = arith.addf %307, %308 : vector<2x32xf32>
    %310 = math.tanh %309 : vector<2x32xf32>
    %311 = arith.mulf %306, %310 : vector<2x32xf32>
    %312 = tpu.concatenate %311, %291 in 1 : vector<2x32xf32>, vector<2x32xf32> -> vector<2x64xf32>
    %cst_44 = arith.constant dense<0.000000e+00> : vector<2x128xf32>
    %313 = tpu.matmul %312, %3, %cst_44 {dimension_numbers = #tpu.dot_dimension_numbers<[1], [0], [0], [1], [0, 0, 1, 1], [], []>} : vector<2x64xf32>, vector<64x128xf32>, vector<2x128xf32> -> vector<2x128xf32>
    %314 = arith.addf %313, %6 : vector<2x128xf32>
    %315 = vector.extract_strided_slice %314 {offsets = [0, 0], sizes = [2, 96], strides = [1, 1]} : vector<2x128xf32> to vector<2x96xf32>
    %316 = arith.negf %315 : vector<2x96xf32>
    %317 = math.exp %316 : vector<2x96xf32>
    %cst_45 = arith.constant 1.000000e+00 : f32
    %318 = vector.broadcast %cst_45 : f32 to vector<2x96xf32>
    %319 = arith.addf %318, %317 : vector<2x96xf32>
    %320 = arith.divf %318, %319 : vector<2x96xf32>
    %321 = vector.extract_strided_slice %314 {offsets = [0, 96], sizes = [2, 32], strides = [1, 1]} : vector<2x128xf32> to vector<2x32xf32>
    %322 = math.tanh %321 : vector<2x32xf32>
    %323 = vector.extract_strided_slice %320 {offsets = [0, 0], sizes = [2, 32], strides = [1, 1]} : vector<2x96xf32> to vector<2x32xf32>
    %324 = vector.extract_strided_slice %320 {offsets = [0, 32], sizes = [2, 32], strides = [1, 1]} : vector<2x96xf32> to vector<2x32xf32>
    %325 = vector.extract_strided_slice %320 {offsets = [0, 64], sizes = [2, 32], strides = [1, 1]} : vector<2x96xf32> to vector<2x32xf32>
    %326 = arith.mulf %324, %289 : vector<2x32xf32>
    %327 = arith.mulf %323, %322 : vector<2x32xf32>
    %328 = arith.addf %326, %327 : vector<2x32xf32>
    %329 = math.tanh %328 : vector<2x32xf32>
    %330 = arith.mulf %325, %329 : vector<2x32xf32>
    %cst_46 = arith.constant dense<0.000000e+00> : vector<2x128xf32>
    %331 = tpu.matmul %330, %7, %cst_46 {dimension_numbers = #tpu.dot_dimension_numbers<[1], [0], [0], [1], [0, 0, 1, 1], [], []>} : vector<2x32xf32>, vector<32x128xf32>, vector<2x128xf32> -> vector<2x128xf32>
    %332 = vector.broadcast %8 : vector<1x128xf32> to vector<2x128xf32>
    %333 = arith.addf %331, %332 : vector<2x128xf32>
    %334 = vector.extract_strided_slice %333 {offsets = [0, 0], sizes = [2, 4], strides = [1, 1]} : vector<2x128xf32> to vector<2x4xf32>
    %c0_47 = arith.constant 0 : index
    %c0_48 = arith.constant 0 : index
    %335 = vector.load %arg3[%c0_47, %c0_48] : memref<2x4xf32, #tpu.memory_space<vmem>>, vector<2x4xf32>
    tpu.vector_store %arg3[%c0_47, %c0_48], %334 {strides = array<i32>} : memref<2x4xf32, #tpu.memory_space<vmem>>, vector<2x4xf32>,
    return
  }
  func.func @transform_0(%arg0: i32) -> (i32, i32, i32) {
    %c0_i32 = arith.constant 0 : i32
    %c0_i32_0 = arith.constant 0 : i32
    %c0_i32_1 = arith.constant 0 : i32
    %c0_i32_2 = arith.constant 0 : i32
    return %c0_i32, %c0_i32_0, %c0_i32_1 : i32, i32, i32
  }
  func.func @transform_1(%arg0: i32) -> (i32, i32) {
    %c0_i32 = arith.constant 0 : i32
    %c0_i32_0 = arith.constant 0 : i32
    %c0_i32_1 = arith.constant 0 : i32
    return %c0_i32, %c0_i32_0 : i32, i32
  }
  func.func @transform_2(%arg0: i32) -> (i32, i32) {
    %c0_i32 = arith.constant 0 : i32
    %c0_i32_0 = arith.constant 0 : i32
    %c0_i32_1 = arith.constant 0 : i32
    return %c0_i32, %c0_i32_0 : i32, i32
  }
}

</mosaic_0001>

<bundles_post_ra>
// kernel: tpu_custom_call.1
= control target key start
LH: loop header
LB: loop body
LE: loop exit
PB: predicated region body
PF: predicated region fallthrough
CT: control target
= control target key end

     0   :  { %7 = vsyncpa [#allocation3], 0  ;;  %s1852_s0 = inlined_call_operand.hbm [shape: f32[8,2,8], index: 0, kind: input, shape index: {}]   ;;  %s1853_s1 = inlined_call_operand.hbm [shape: f32[160,128], index: 1, kind: input, shape index: {}]   ;;  %s1854_s2 = inlined_call_operand.hbm [shape: f32[2,4], index: 2, kind: output, shape index: {}]  }
   0x1   :  { %8 = vsyncpa [#allocation6], 0 }
   0x2   :  { %9 = vsyncpa [#allocation4], 0  ;;  %s14_s11 = sshll.u32 %s1852_s0, 4  ;;  %s1516_s12 = smov [#allocation2]   ;;  %s15_s11 = int_to_ptr.hbm [resolvable:$true] %s14_s11 }
   0x3   :  { %s16_s13 = sshll.u32 %s1516_s12, 4  ;;  %s27_s16 = sshll.u32 %s1853_s1, 4  ;;  %s17_s13 = int_to_ptr.vmem [resolvable:$true] %s16_s13  ;;  %s28_s16 = int_to_ptr.hbm [resolvable:$true] %s27_s16 }
   0x4   :  { %s1517_s17 = smov 32   ;;  %s1518_s18 = smov 2  }
   0x5   :  { %22 = dma.hbm_to_vmem [thread:$0]  %s15_s11, 256, %s17_s13, [#allocation3], %s1517_s17, %s1517_s17, %s1518_s18  }
   0x6   :  { %s1519_s19 = smov [#allocation5]   ;;  %s1520_s21 = smov 128  }
   0x7   :  { %s29_s20 = sshll.u32 %s1519_s19, 4  ;;  %s1521_s22 = smov 8   ;;  %s30_s20 = int_to_ptr.vmem [resolvable:$true] %s29_s20 }
   0x8   :  { %35 = dma.hbm_to_vmem [thread:$0]  %s28_s16, 2560, %s30_s20, [#allocation6], %s1520_s21, %s1520_s21, %s1521_s22  }
   0x9   :  { %1510 = dma.done.wait [#allocation3], 256  }
   0xa   :  { %1511 = vsyncadd [#allocation3], 4294967040 }
   0xb   :  { %1512 = dma.done.wait [#allocation6], 2560  }
   0xc   :  { %1513 = vsyncadd [#allocation6], 4294964736  ;;  %v1549_v0 = vld [vmem:[#allocation5 + $0x20] sm:$0xff]  ;;  %v1551_v1 = vld [vmem:[#allocation5 + $0x18] sm:$0xff]  ;;  %v1522_v9 = vmov 0.0   ;;  %vm99_vm0 = vcmask 64512  }
   0xd   :  { %v44_v2 = vld [vmem:[#allocation5] sm:$0xff]  ;;  %157 = vmatpush.msra.mxu1 %v1549_v0  ;;  %v1554_v3 = vld [vmem:[#allocation5 + $0x10] sm:$0xff]  ;;  %289 = vmatpush.msra.mxu3 %v1549_v0  ;;  %v1558_v8 = vld [vmem:[#allocation5 + $0x8] sm:$0xff]  ;;  %s1523_s0 = smov 64   ;;  %vm141_vm5 = vcmask 261120   ;;  %vm210_vm6 = vcmask 523264  }
   0xe   :  { %119 = vmatpush.msra.mxu0 %v44_v2  ;;  %v65_v4 = vld [vmem:[#allocation2] sm:$0x3]  ;;  %v66_v5 = vld [vmem:[#allocation2 + $0x2] sm:$0x3]  ;;  %v67_v6 = vld [vmem:[#allocation2 + $0x4] sm:$0x3] }
   0xf   :  { %v68_v7 = vld [vmem:[#allocation2 + $0x6] sm:$0x3]  ;;  %82 = vst [vmem:[#allocation1] ss:$4 sm:$0xff] %v65_v4  ;;  %158 = vmatpush.msra.mxu1 %v1551_v1  ;;  %290 = vmatpush.msra.mxu3 %v1551_v1  ;;  %v1574_v11 = vld [vmem:[#allocation5 + $0x28] ss:$0 sm:$0xff] }
  0x10   :  { %84 = vst [vmem:[#allocation1 + $0x1] ss:$4 sm:$0xff] %v66_v5  ;;  %v1586_v36 = vld [vmem:[#allocation5 + $0x68] sm:$0xff]  ;;  %v1588_v37 = vld [vmem:[#allocation5 + $0x60] sm:$0xff]  ;;  %v1592_v38 = vld [vmem:[#allocation5 + $0x58] sm:$0xff]  ;;  %s1524_s1 = smov 96  }
  0x11   :  { %86 = vst [vmem:[#allocation1 + $0x2] ss:$4 sm:$0xff] %v67_v6  ;;  %159 = vmatpush.msra.mxu1 %v1554_v3  ;;  %291 = vmatpush.msra.mxu3 %v1554_v3  ;;  %v1597_v39 = vld [vmem:[#allocation5 + $0x50] sm:$0xff]  ;;  %v1602_v40 = vld [vmem:[#allocation5 + $0x48] sm:$0xff]  ;;  %v1607_v41 = vld [vmem:[#allocation5 + $0x40] sm:$0xff]  ;;  %s1525_s23 = smov [#allocation7]  }
  0x12   :  { %88 = vst [vmem:[#allocation1 + $0x3] ss:$4 sm:$0xff] %v68_v7  ;;  %222 = vmatpush.msra.mxu2 %v1586_v36  ;;  %357 = vmatpush.msrb.mxu0 %v1586_v36  ;;  %v1612_v42 = vld [vmem:[#allocation5 + $0x38] sm:$0xff]  ;;  %v1623_v47 = vld [vmem:[#allocation5 + $0x30] sm:$0xff]  ;;  %s1249_s24 = sshll.u32 %s1525_s23, 4  ;;  %s1251_s27 = sshll.u32 %s1854_s2, 4  ;;  %s1250_s24 = int_to_ptr.vmem [resolvable:$true] %s1249_s24  ;;  %s1252_s27 = int_to_ptr.hbm [resolvable:$true] %s1251_s27 }
  0x13   :  { %160 = vmatpush.msra.mxu1 %v1558_v8  ;;  %292 = vmatpush.msra.mxu3 %v1558_v8  ;;  %v1652_v54 = vld [vmem:[#allocation5 + $0x70] ss:$0 sm:$0xff] }
  0x14   :  { %161 = vmatmul.f32.vlgmr.msra.gmra.mxu1 %v1522_v9  ;;  %223 = vmatpush.msra.mxu2 %v1588_v37 }
  0x15   :  { %424 = vmatpush.msrb.mxu1 %v1549_v0  ;;  %492 = vmatpush.msrb.mxu3 %v1586_v36 }
  0x16   :  { %358 = vmatpush.msrb.mxu0 %v1588_v37  ;;  %224 = vmatpush.msra.mxu2 %v1592_v38 }
  0x17   :  { %425 = vmatpush.msrb.mxu1 %v1551_v1  ;;  %493 = vmatpush.msrb.mxu3 %v1588_v37 }
  0x18   :  { %359 = vmatpush.msrb.mxu0 %v1592_v38  ;;  %225 = vmatpush.msra.mxu2 %v1597_v39 }
  0x19   :  { %v97_v10 = vld.sshfl [vmem:[#allocation1] sm:$0xff pattern:$0x73625140]  ;;  %426 = vmatpush.msrb.mxu1 %v1554_v3  ;;  %494 = vmatpush.msrb.mxu3 %v1592_v38 }
  0x1a   :  { %1262 = vmatmul.msk.f32.vlgmr.msra.gmra.mxu0 %vm99_vm0, %v97_v10  ;;  %226 = vmatpush.msra.mxu2 %v1602_v40 }
  0x1b   :  { %427 = vmatpush.msrb.mxu1 %v1558_v8  ;;  %360 = vmatpush.msrb.mxu0 %v1597_v39 }
  0x1c   :  { %495 = vmatpush.msrb.mxu3 %v1597_v39  ;;  %227 = vmatpush.msra.mxu2 %v1607_v41 }
  0x1d   :  { %559 = vmatpush.msra.mxu1 %v1549_v0  ;;  %361 = vmatpush.msrb.mxu0 %v1602_v40 }
  0x1e   :  { %496 = vmatpush.msrb.mxu3 %v1602_v40  ;;  %228 = vmatpush.msra.mxu2 %v1612_v42 }
  0x1f   :  { %560 = vmatpush.msra.mxu1 %v1551_v1  ;;  %362 = vmatpush.msrb.mxu0 %v1607_v41 }
  0x20   :  { %497 = vmatpush.msrb.mxu3 %v1607_v41  ;;  %229 = vmatpush.msra.mxu2 %v1623_v47 }
  0x21   :  { %561 = vmatpush.msra.mxu1 %v1554_v3  ;;  %363 = vmatpush.msrb.mxu0 %v1612_v42 }
  0x22   :  { %498 = vmatpush.msrb.mxu3 %v1612_v42  ;;  %627 = vmatpush.msrb.mxu2 %v1586_v36 }
  0x23   :  { %562 = vmatpush.msra.mxu1 %v1558_v8  ;;  %364 = vmatpush.msrb.mxu0 %v1623_v47 }
  0x24   :  { %499 = vmatpush.msrb.mxu3 %v1623_v47  ;;  %628 = vmatpush.msrb.mxu2 %v1588_v37 }
  0x25   :  { %694 = vmatpush.msra.mxu0 %v1549_v0 }
  0x26   :  { %629 = vmatpush.msrb.mxu2 %v1592_v38 }
  0x27   :  { %695 = vmatpush.msra.mxu0 %v1551_v1 }
  0x28   :  { %630 = vmatpush.msrb.mxu2 %v1597_v39 }
  0x29   :  { %696 = vmatpush.msra.mxu0 %v1554_v3 }
  0x2a   :  { %631 = vmatpush.msrb.mxu2 %v1602_v40 }
  0x2b   :  { %697 = vmatpush.msra.mxu0 %v1558_v8 }
  0x2c   :  { %632 = vmatpush.msrb.mxu2 %v1607_v41 }
  0x2e   :  { %633 = vmatpush.msrb.mxu2 %v1612_v42 }
  0x30   :  { %634 = vmatpush.msrb.mxu2 %v1623_v47 }
  0x91   :  { %v162_v13 = vpop.f32.mrf.mxu1 }
  0x97   :  { %v121_v12 = vpop.f32.mrf.mxu0 }
  0x98   :  { %v1577_v14 = vadd.f32 %v1574_v11, %v121_v12 }
  0x9a   :  { %v165_v15 = vadd.f32 %v162_v13, %v1577_v14  ;;  %v129_v51 = vrot.slane %v1577_v14, 2 }
  0x9c   :  { %1309 = vtanh.f32 %v165_v15  ;;  %v1264_v17 = vmul.f32 -1.442695, %v165_v15 }
  0x9e   :  { %1311 = vpow2.f32 %v1264_v17 }
  0xa2   :  { %v1310_v16 = vpop.eup %1309 }
  0xa3   :  { %188 = vrot.lane.b32.xlu0 %v1310_v16, %s1517_s17 }
  0xa4   :  { %v1312_v18 = vpop.eup %1311 }
  0xa5   :  { %v169_v19 = vadd.f32 1.0, %v1312_v18 }
  0xa7   :  { %1313 = vrcp.f32 %v169_v19  ;;  %v181_v25 = vand.u32 2147483648, %v169_v19  ;;  %vm175_vm2 = vweird.f32 %v169_v19  ;;  %v179_v26 = vand.u32 2147483647, %v169_v19 }
  0xa9   :  { %v182_v28 = vor.u32 1.1754944e-38, %v181_v25  ;;  %vm180_vm4 = vcmp.eq.f32.partialorder %v179_v26, 8.507059e+37 }
  0xad   :  { %v1314_v20 = vpop.eup %1313 }
  0xae   :  { %v171_v21 = vmul.f32 %v1314_v20, %v169_v19  ;;  %vm176_vm1 = vweird.f32 %v1314_v20 }
  0xaf   :  { %vm177_vm3 = vmor %vm175_vm2, %vm176_vm1 }
  0xb0   :  { %v172_v22 = vsub.f32 1.0, %v171_v21 }
  0xb2   :  { %v173_v23 = vmul.f32 %v1314_v20, %v172_v22 }
  0xb4   :  { %v174_v24 = vadd.f32 %v1314_v20, %v173_v23 }
  0xb6   :  { %v178_v27 = vsel %vm177_vm3, %v1314_v20, %v174_v24 }
  0xb7   :  { %v183_v30 = vsel %vm180_vm4, %v182_v28, %v178_v27 }
  0xb8   :  { %v186_v32 = vmul.f32 0.0, %v183_v30 }
 0x115   :  { %v189_v29 = vpop.permute.xlu0 %188 }
 0x116   :  { %v191_v31 = vmul.f32 %v189_v29, %v183_v30 }
 0x118   :  { %193 = vrot.lane.b32.xlu0 %v191_v31, %s1517_s17 }
 0x18a   :  { %v194_v33 = vpop.permute.xlu0 %193 }
 0x18b   :  { %v1582_v34 = vadd.f32 %v194_v33, %v186_v32 }
 0x18d   :  { %1315 = vtanh.f32 %v1582_v34 }
 0x193   :  { %v1316_v35 = vpop.eup %1315 }
 0x194   :  { %199 = vrot.lane.b32.xlu1 %v1316_v35, %s1517_s17 }
 0x206   :  { %v200_v43 = vpop.permute.xlu1 %199 }
 0x207   :  { %v202_v44 = vmul.f32 %v200_v43, %v183_v30 }
 0x209   :  { %204 = vst [vmem:[#allocation1] ss:$4 sm:$0xff] %v202_v44 }
 0x210   :  { %v205_v45 = vld.sshfl [vmem:[#allocation1] sm:$0xff pattern:$0x73625140] }
 0x211   :  { %271 = vst [vmem:[#allocation1] ss:$4 sm:$0xff] %v202_v44  ;;  %206 = vrot.lane.b32.xlu2 %v205_v45, %s1523_s0 }
 0x218   :  { %v272_v46 = vld.sshfl [vmem:[#allocation1] sm:$0xff pattern:$0x73625140] }
 0x219   :  { %273 = vrot.lane.b32.xlu1 %v272_v46, %s1523_s0 }
 0x26b   :  { %v207_v48 = vpop.permute.xlu2 %206 }
 0x26c   :  { %v209_v49 = vsel %vm141_vm5, %v207_v48, 0.0 }
 0x26d   :  { %1265 = vmatmul.msk.f32.vlgmr.msra.gmra.mxu2 %vm210_vm6, %v209_v49 }
 0x26e   :  { %964 = vmatpush.msra.mxu2 %v1549_v0 }
 0x270   :  { %965 = vmatpush.msra.mxu2 %v1551_v1 }
 0x272   :  { %966 = vmatpush.msra.mxu2 %v1554_v3 }
 0x274   :  { %967 = vmatpush.msra.mxu2 %v1558_v8 }
 0x28b   :  { %v274_v50 = vpop.permute.xlu1 %273 }
 0x28c   :  { %1267 = vmatmul.msk.f32.vlgmr.msra.gmra.mxu3 %vm141_vm5, %v274_v50 }
 0x28d   :  { %829 = vmatpush.msra.mxu3 %v1549_v0 }
 0x28f   :  { %830 = vmatpush.msra.mxu3 %v1551_v1 }
 0x291   :  { %831 = vmatpush.msra.mxu3 %v1554_v3 }
 0x293   :  { %832 = vmatpush.msra.mxu3 %v1558_v8 }
 0x2f0   :  { %v231_v55 = vpop.f32.mrf.mxu2 }
 0x2f1   :  { %v232_v56 = vadd.f32 %v1652_v54, %v231_v55  ;;  %v70_v55 = vld [vmem:[#allocation2 + $0xa] sm:$0x3] }
 0x2f2   :  { %92 = vst [vmem:[#allocation1 + $0x21] ss:$4 sm:$0xff] %v70_v55 }
 0x2f3   :  { %v1266_v60 = vmul.f32 -1.442695, %v232_v56 }
 0x30f   :  { %v294_v52 = vpop.f32.mrf.mxu3 }
 0x310   :  { %v297_v53 = vadd.f32 %v294_v52, %v129_v51 }
 0x312   :  { %1317 = vtanh.f32 %v297_v53  ;;  %v1268_v59 = vmul.f32 -1.442695, %v297_v53  ;;  %v69_v53 = vld [vmem:[#allocation2 + $0x8] sm:$0x3] }
 0x313   :  { %1319 = vtanh.f32 %v232_v56  ;;  %v71_v56 = vld [vmem:[#allocation2 + $0xc] sm:$0x3]  ;;  %90 = vst [vmem:[#allocation1 + $0x20] ss:$4 sm:$0xff] %v69_v53 }
 0x314   :  { %1321 = vpow2.f32 %v1268_v59  ;;  %94 = vst [vmem:[#allocation1 + $0x22] ss:$4 sm:$0xff] %v71_v56 }
 0x315   :  { %1323 = vpow2.f32 %v1266_v60 }
 0x318   :  { %v1318_v57 = vpop.eup %1317 }
 0x319   :  { %320 = vrot.lane.b32.xlu2 %v1318_v57, %s1517_s17  ;;  %v1320_v58 = vpop.eup %1319  ;;  %v72_v57 = vld [vmem:[#allocation2 + $0xe] sm:$0x3] }
 0x31a   :  { %v1322_v61 = vpop.eup %1321  ;;  %96 = vst [vmem:[#allocation1 + $0x23] ss:$4 sm:$0xff] %v72_v57 }
 0x31b   :  { %v301_v62 = vadd.f32 1.0, %v1322_v61  ;;  %v1324_v63 = vpop.eup %1323 }
 0x31c   :  { %v237_v2 = vadd.f32 1.0, %v1324_v63  ;;  %v130_v63 = vrot.slane %v1577_v14, 4 }
 0x31d   :  { %1325 = vrcp.f32 %v301_v62  ;;  %v313_v15 = vand.u32 2147483648, %v301_v62  ;;  %vm307_vm8 = vweird.f32 %v301_v62  ;;  %v311_v16 = vand.u32 2147483647, %v301_v62 }
 0x31e   :  { %1327 = vrcp.f32 %v237_v2  ;;  %v249_v24 = vand.u32 2147483648, %v237_v2  ;;  %vm243_vm12 = vweird.f32 %v237_v2  ;;  %v247_v25 = vand.u32 2147483647, %v237_v2 }
 0x31f   :  { %v314_v19 = vor.u32 1.1754944e-38, %v313_v15  ;;  %vm312_vm10 = vcmp.eq.f32.partialorder %v311_v16, 8.507059e+37 }
 0x320   :  { %v250_v27 = vor.u32 1.1754944e-38, %v249_v24  ;;  %vm248_vm14 = vcmp.eq.f32.partialorder %v247_v25, 8.507059e+37 }
 0x321   :  { %256 = vrot.lane.b32.xlu2 %v1320_v58, %s1517_s17  ;;  %v98_v58 = vld.sshfl [vmem:[#allocation1 + $0x20] sm:$0xff pattern:$0x73625140] }
 0x322   :  { %1263 = vmatmul.msk.f32.gmra.mxu0 %vm99_vm0, %v98_v58 }
 0x323   :  { %v1326_v4 = vpop.eup %1325 }
 0x324   :  { %v303_v5 = vmul.f32 %v1326_v4, %v301_v62  ;;  %v1328_v7 = vpop.eup %1327  ;;  %vm308_vm7 = vweird.f32 %v1326_v4 }
 0x325   :  { %v239_v10 = vmul.f32 %v1328_v7, %v237_v2  ;;  %vm309_vm9 = vmor %vm307_vm8, %vm308_vm7  ;;  %vm244_vm11 = vweird.f32 %v1328_v7 }
 0x326   :  { %v304_v6 = vsub.f32 1.0, %v303_v5  ;;  %vm245_vm13 = vmor %vm243_vm12, %vm244_vm11 }
 0x327   :  { %v240_v13 = vsub.f32 1.0, %v239_v10 }
 0x328   :  { %v305_v9 = vmul.f32 %v1326_v4, %v304_v6 }
 0x329   :  { %v241_v18 = vmul.f32 %v1328_v7, %v240_v13 }
 0x32a   :  { %v306_v12 = vadd.f32 %v1326_v4, %v305_v9 }
 0x32b   :  { %v242_v23 = vadd.f32 %v1328_v7, %v241_v18 }
 0x32c   :  { %v310_v17 = vsel %vm309_vm9, %v1326_v4, %v306_v12 }
 0x32d   :  { %v315_v21 = vsel %vm312_vm10, %v314_v19, %v310_v17  ;;  %v246_v26 = vsel %vm245_vm13, %v1328_v7, %v242_v23 }
 0x32e   :  { %v251_v28 = vsel %vm248_vm14, %v250_v27, %v246_v26  ;;  %v318_v31 = vmul.f32 %v315_v21, %v1582_v34 }
 0x32f   :  { %v254_v35 = vmul.f32 0.0, %v251_v28 }
 0x373   :  { %v321_v20 = vpop.permute.xlu2 %320 }
 0x374   :  { %v323_v22 = vmul.f32 %v321_v20, %v315_v21 }
 0x376   :  { %325 = vrot.lane.b32.xlu0 %v323_v22, %s1517_s17 }
 0x37b   :  { %v257_v29 = vpop.permute.xlu2 %256 }
 0x37c   :  { %v259_v30 = vmul.f32 %v257_v29, %v251_v28 }
 0x37e   :  { %261 = vrot.lane.b32.xlu0 %v259_v30, %s1517_s17 }
 0x39f   :  { %v1692_v2 = vpop.f32.mrf.mxu0 }
 0x3e8   :  { %v326_v32 = vpop.permute.xlu0 %325 }
 0x3e9   :  { %v1660_v33 = vadd.f32 %v326_v32, %v318_v31 }
 0x3eb   :  { %1329 = vtanh.f32 %v1660_v33 }
 0x3f0   :  { %v262_v43 = vpop.permute.xlu0 %261 }
 0x3f1   :  { %v1330_v44 = vpop.eup %1329  ;;  %v1663_v45 = vadd.f32 %v262_v43, %v254_v35 }
 0x3f2   :  { %331 = vrot.lane.b32.xlu1 %v1330_v44, %s1517_s17 }
 0x3f3   :  { %1331 = vtanh.f32 %v1663_v45 }
 0x3f9   :  { %v1332_v46 = vpop.eup %1331 }
 0x3fa   :  { %267 = vrot.lane.b32.xlu2 %v1332_v46, %s1517_s17 }
 0x454   :  { %v268_v51 = vpop.permute.xlu2 %267 }
 0x455   :  { %v270_v52 = vmul.f32 %v268_v51, %v251_v28 }
 0x464   :  { %v332_v48 = vpop.permute.xlu1 %331 }
 0x465   :  { %v334_v49 = vmul.f32 %v332_v48, %v315_v21 }
 0x467   :  { %336 = vst [vmem:[#allocation1] ss:$4 sm:$0xff] %v334_v49 }
 0x46e   :  { %v337_v34 = vld.sshfl [vmem:[#allocation1] sm:$0xff pattern:$0x73625140] }
 0x46f   :  { %406 = vst [vmem:[#allocation1] ss:$4 sm:$0xff] %v334_v49  ;;  %338 = vrot.lane.b32.xlu0 %v337_v34, %s1523_s0 }
 0x476   :  { %v407_v50 = vld.sshfl [vmem:[#allocation1] sm:$0xff pattern:$0x73625140] }
 0x477   :  { %408 = vrot.lane.b32.xlu1 %v407_v50, %s1523_s0 }
 0x47f   :  { %342 = vrot.lane.b32.xlu1 %v270_v52, %s1524_s1 }
 0x4e1   :  { %v339_v60 = vpop.permute.xlu0 %338 }
 0x4e9   :  { %v409_v59 = vpop.permute.xlu1 %408 }
 0x4ea   :  { %1271 = vmatmul.msk.f32.vlgmr.msrb.gmra.mxu1 %vm141_vm5, %v409_v59 }
 0x4eb   :  { %762 = vmatpush.msrb.mxu1 %v1586_v36 }
 0x4ed   :  { %763 = vmatpush.msrb.mxu1 %v1588_v37 }
 0x4ef   :  { %764 = vmatpush.msrb.mxu1 %v1592_v38 }
 0x4f1   :  { %v343_v61 = vpop.permute.xlu1 %342  ;;  %765 = vmatpush.msrb.mxu1 %v1597_v39 }
 0x4f2   :  { %v345_v62 = vsel %vm141_vm5, %v339_v60, %v343_v61 }
 0x4f3   :  { %1269 = vmatmul.msk.f32.vlgmr.msrb.gmra.mxu0 %vm210_vm6, %v345_v62  ;;  %766 = vmatpush.msrb.mxu1 %v1602_v40 }
 0x4f4   :  { %897 = vmatpush.msrb.mxu0 %v1586_v36 }
 0x4f5   :  { %767 = vmatpush.msrb.mxu1 %v1607_v41 }
 0x4f6   :  { %898 = vmatpush.msrb.mxu0 %v1588_v37 }
 0x4f7   :  { %768 = vmatpush.msrb.mxu1 %v1612_v42 }
 0x4f8   :  { %899 = vmatpush.msrb.mxu0 %v1592_v38 }
 0x4f9   :  { %769 = vmatpush.msrb.mxu1 %v1623_v47 }
 0x4fa   :  { %900 = vmatpush.msrb.mxu0 %v1597_v39 }
 0x4fc   :  { %901 = vmatpush.msrb.mxu0 %v1602_v40 }
 0x4fe   :  { %902 = vmatpush.msrb.mxu0 %v1607_v41 }
 0x500   :  { %903 = vmatpush.msrb.mxu0 %v1612_v42 }
 0x502   :  { %904 = vmatpush.msrb.mxu0 %v1623_v47 }
 0x567   :  { %v429_v4 = vpop.f32.mrf.mxu1 }
 0x568   :  { %v432_v5 = vadd.f32 %v429_v4, %v130_v63 }
 0x56a   :  { %1333 = vtanh.f32 %v432_v5  ;;  %v1272_v12 = vmul.f32 -1.442695, %v432_v5 }
 0x570   :  { %v1334_v6 = vpop.eup %1333  ;;  %v366_v7 = vpop.f32.mrf.mxu0 }
 0x571   :  { %v367_v9 = vadd.f32 %v1652_v54, %v366_v7  ;;  %455 = vrot.lane.b32.xlu2 %v1334_v6, %s1517_s17 }
 0x573   :  { %1335 = vtanh.f32 %v367_v9  ;;  %v1270_v19 = vmul.f32 -1.442695, %v367_v9 }
 0x574   :  { %1337 = vpow2.f32 %v1272_v12 }
 0x579   :  { %v1336_v10 = vpop.eup %1335 }
 0x57a   :  { %391 = vrot.lane.b32.xlu1 %v1336_v10, %s1517_s17  ;;  %v1338_v13 = vpop.eup %1337 }
 0x57b   :  { %v436_v15 = vadd.f32 1.0, %v1338_v13 }
 0x57d   :  { %1339 = vrcp.f32 %v436_v15  ;;  %v448_v22 = vand.u32 2147483648, %v436_v15  ;;  %vm442_vm0 = vweird.f32 %v436_v15  ;;  %v446_v23 = vand.u32 2147483647, %v436_v15 }
 0x57e   :  { %1341 = vpow2.f32 %v1270_v19 }
 0x57f   :  { %v449_v26 = vor.u32 1.1754944e-38, %v448_v22  ;;  %vm447_vm2 = vcmp.eq.f32.partialorder %v446_v23, 8.507059e+37 }
 0x583   :  { %v1340_v16 = vpop.eup %1339 }
 0x584   :  { %v438_v17 = vmul.f32 %v1340_v16, %v436_v15  ;;  %vm443_vm15 = vweird.f32 %v1340_v16  ;;  %v1342_v25 = vpop.eup %1341 }
 0x585   :  { %vm444_vm1 = vmor %vm442_vm0, %vm443_vm15  ;;  %v372_v29 = vadd.f32 1.0, %v1342_v25 }
 0x586   :  { %v439_v18 = vsub.f32 1.0, %v438_v17 }
 0x587   :  { %1343 = vrcp.f32 %v372_v29  ;;  %v384_v46 = vand.u32 2147483648, %v372_v29  ;;  %vm378_vm4 = vweird.f32 %v372_v29  ;;  %v382_v48 = vand.u32 2147483647, %v372_v29 }
 0x588   :  { %v440_v20 = vmul.f32 %v1340_v16, %v439_v18 }
 0x589   :  { %v385_v34 = vor.u32 1.1754944e-38, %v384_v46  ;;  %vm383_vm8 = vcmp.eq.f32.partialorder %v382_v48, 8.507059e+37 }
 0x58a   :  { %v441_v21 = vadd.f32 %v1340_v16, %v440_v20 }
 0x58c   :  { %v445_v24 = vsel %vm444_vm1, %v1340_v16, %v441_v21 }
 0x58d   :  { %v450_v28 = vsel %vm447_vm2, %v449_v26, %v445_v24  ;;  %v1344_v31 = vpop.eup %1343 }
 0x58e   :  { %v374_v32 = vmul.f32 %v1344_v31, %v372_v29  ;;  %vm379_vm3 = vweird.f32 %v1344_v31  ;;  %v453_v53 = vmul.f32 %v450_v28, %v1660_v33 }
 0x58f   :  { %vm380_vm7 = vmor %vm378_vm4, %vm379_vm3 }
 0x590   :  { %v375_v35 = vsub.f32 1.0, %v374_v32 }
 0x592   :  { %v376_v43 = vmul.f32 %v1344_v31, %v375_v35 }
 0x594   :  { %v377_v44 = vadd.f32 %v1344_v31, %v376_v43 }
 0x596   :  { %v381_v49 = vsel %vm380_vm7, %v1344_v31, %v377_v44 }
 0x597   :  { %v386_v51 = vsel %vm383_vm8, %v385_v34, %v381_v49 }
 0x598   :  { %v389_v58 = vmul.f32 %v386_v51, %v1663_v45 }
 0x5cb   :  { %v456_v27 = vpop.permute.xlu2 %455 }
 0x5cc   :  { %v458_v30 = vmul.f32 %v456_v27, %v450_v28 }
 0x5ce   :  { %460 = vrot.lane.b32.xlu0 %v458_v30, %s1517_s17 }
 0x5ec   :  { %v392_v50 = vpop.permute.xlu1 %391 }
 0x5ed   :  { %v394_v52 = vmul.f32 %v392_v50, %v386_v51 }
 0x5ef   :  { %396 = vrot.lane.b32.xlu0 %v394_v52, %s1517_s17 }
 0x640   :  { %v461_v55 = vpop.permute.xlu0 %460 }
 0x641   :  { %v1700_v56 = vadd.f32 %v461_v55, %v453_v53 }
 0x643   :  { %1345 = vtanh.f32 %v1700_v56 }
 0x649   :  { %v1346_v57 = vpop.eup %1345 }
 0x64a   :  { %466 = vrot.lane.b32.xlu2 %v1346_v57, %s1517_s17 }
 0x661   :  { %v397_v59 = vpop.permute.xlu0 %396 }
 0x662   :  { %v1705_v60 = vadd.f32 %v397_v59, %v389_v58 }
 0x664   :  { %1347 = vtanh.f32 %v1705_v60 }
 0x66a   :  { %v1348_v61 = vpop.eup %1347 }
 0x66b   :  { %402 = vrot.lane.b32.xlu2 %v1348_v61, %s1517_s17 }
 0x6a4   :  { %v467_v62 = vpop.permute.xlu2 %466 }
 0x6a5   :  { %v469_v33 = vmul.f32 %v467_v62, %v450_v28 }
 0x6a7   :  { %471 = vst [vmem:[#allocation1] ss:$4 sm:$0xff] %v469_v33 }
 0x6ae   :  { %v472_v63 = vld.sshfl [vmem:[#allocation1] sm:$0xff pattern:$0x73625140] }
 0x6af   :  { %473 = vrot.lane.b32.xlu0 %v472_v63, %s1523_s0  ;;  %541 = vst [vmem:[#allocation1] ss:$4 sm:$0xff] %v469_v33 }
 0x6b6   :  { %v542_v4 = vld.sshfl [vmem:[#allocation1] sm:$0xff pattern:$0x73625140] }
 0x6b7   :  { %543 = vrot.lane.b32.xlu1 %v542_v4, %s1523_s0 }
 0x6c5   :  { %v403_v5 = vpop.permute.xlu2 %402 }
 0x6c6   :  { %v405_v45 = vmul.f32 %v403_v5, %v386_v51 }
 0x6c8   :  { %477 = vrot.lane.b32.xlu1 %v405_v45, %s1524_s1 }
 0x721   :  { %v474_v7 = vpop.permute.xlu0 %473 }
 0x729   :  { %v544_v6 = vpop.permute.xlu1 %543 }
 0x72a   :  { %1275 = vmatmul.msk.f32.vlgmr.msra.gmra.mxu1 %vm141_vm5, %v544_v6 }
 0x72b   :  { %1099 = vmatpush.msra.mxu1 %v1549_v0  ;;  %v131_v0 = vrot.slane %v1577_v14, 6 }
 0x72d   :  { %1100 = vmatpush.msra.mxu1 %v1551_v1 }
 0x72f   :  { %1101 = vmatpush.msra.mxu1 %v1554_v3 }
 0x731   :  { %1102 = vmatpush.msra.mxu1 %v1558_v8 }
 0x73a   :  { %v478_v9 = vpop.permute.xlu1 %477 }
 0x73b   :  { %v480_v10 = vsel %vm141_vm5, %v474_v7, %v478_v9 }
 0x73c   :  { %1273 = vmatmul.msk.f32.vlgmr.msrb.gmra.mxu3 %vm210_vm6, %v480_v10 }
 0x73d   :  { %1032 = vmatpush.msrb.mxu3 %v1586_v36 }
 0x73f   :  { %1033 = vmatpush.msrb.mxu3 %v1588_v37 }
 0x741   :  { %1034 = vmatpush.msrb.mxu3 %v1592_v38 }
 0x743   :  { %1035 = vmatpush.msrb.mxu3 %v1597_v39 }
 0x745   :  { %1036 = vmatpush.msrb.mxu3 %v1602_v40 }
 0x747   :  { %1037 = vmatpush.msrb.mxu3 %v1607_v41 }
 0x749   :  { %1038 = vmatpush.msrb.mxu3 %v1612_v42 }
 0x74b   :  { %1039 = vmatpush.msrb.mxu3 %v1623_v47 }
 0x7a7   :  { %v564_v1 = vpop.f32.mrf.mxu1 }
 0x7a8   :  { %v567_v3 = vadd.f32 %v564_v1, %v131_v0 }
 0x7aa   :  { %1349 = vtanh.f32 %v567_v3  ;;  %v1276_v16 = vmul.f32 -1.442695, %v567_v3  ;;  %v1759_v3 = vadd.f32 %v1574_v11, %v1692_v2 }
 0x7b0   :  { %v1350_v8 = vpop.eup %1349 }
 0x7b1   :  { %590 = vrot.lane.b32.xlu2 %v1350_v8, %s1517_s17 }
 0x7bf   :  { %v501_v12 = vpop.f32.mrf.mxu3 }
 0x7c0   :  { %v502_v13 = vadd.f32 %v1652_v54, %v501_v12 }
 0x7c2   :  { %1351 = vtanh.f32 %v502_v13  ;;  %v1274_v30 = vmul.f32 -1.442695, %v502_v13 }
 0x7c3   :  { %1353 = vpow2.f32 %v1276_v16 }
 0x7c8   :  { %v1352_v15 = vpop.eup %1351 }
 0x7c9   :  { %526 = vrot.lane.b32.xlu1 %v1352_v15, %s1517_s17  ;;  %v1354_v17 = vpop.eup %1353 }
 0x7ca   :  { %v571_v18 = vadd.f32 1.0, %v1354_v17 }
 0x7cc   :  { %1355 = vrcp.f32 %v571_v18  ;;  %v583_v23 = vand.u32 2147483648, %v571_v18  ;;  %vm577_vm10 = vweird.f32 %v571_v18  ;;  %v581_v24 = vand.u32 2147483647, %v571_v18 }
 0x7cd   :  { %1357 = vpow2.f32 %v1274_v30 }
 0x7ce   :  { %v584_v26 = vor.u32 1.1754944e-38, %v583_v23  ;;  %vm582_vm12 = vcmp.eq.f32.partialorder %v581_v24, 8.507059e+37 }
 0x7d2   :  { %v1356_v19 = vpop.eup %1355 }
 0x7d3   :  { %v573_v14 = vmul.f32 %v1356_v19, %v571_v18  ;;  %vm578_vm9 = vweird.f32 %v1356_v19  ;;  %v1358_v31 = vpop.eup %1357 }
 0x7d4   :  { %vm579_vm11 = vmor %vm577_vm10, %vm578_vm9  ;;  %v507_v32 = vadd.f32 1.0, %v1358_v31 }
 0x7d5   :  { %v574_v20 = vsub.f32 1.0, %v573_v14 }
 0x7d6   :  { %1359 = vrcp.f32 %v507_v32  ;;  %v519_v49 = vand.u32 2147483648, %v507_v32  ;;  %vm513_vm14 = vweird.f32 %v507_v32  ;;  %v517_v34 = vand.u32 2147483647, %v507_v32 }
 0x7d7   :  { %v575_v21 = vmul.f32 %v1356_v19, %v574_v20 }
 0x7d8   :  { %v520_v51 = vor.u32 1.1754944e-38, %v519_v49  ;;  %vm518_vm0 = vcmp.eq.f32.partialorder %v517_v34, 8.507059e+37 }
 0x7d9   :  { %v576_v22 = vadd.f32 %v1356_v19, %v575_v21 }
 0x7db   :  { %v580_v25 = vsel %vm579_vm11, %v1356_v19, %v576_v22 }
 0x7dc   :  { %v585_v27 = vsel %vm582_vm12, %v584_v26, %v580_v25  ;;  %v1360_v35 = vpop.eup %1359 }
 0x7dd   :  { %v509_v43 = vmul.f32 %v1360_v35, %v507_v32  ;;  %vm514_vm13 = vweird.f32 %v1360_v35  ;;  %v588_v57 = vmul.f32 %v585_v27, %v1700_v56 }
 0x7de   :  { %vm515_vm15 = vmor %vm513_vm14, %vm514_vm13 }
 0x7df   :  { %v510_v44 = vsub.f32 1.0, %v509_v43 }
 0x7e1   :  { %v511_v46 = vmul.f32 %v1360_v35, %v510_v44 }
 0x7e3   :  { %v512_v48 = vadd.f32 %v1360_v35, %v511_v46 }
 0x7e5   :  { %v516_v50 = vsel %vm515_vm15, %v1360_v35, %v512_v48 }
 0x7e6   :  { %v521_v53 = vsel %vm518_vm0, %v520_v51, %v516_v50 }
 0x7e7   :  { %v524_v62 = vmul.f32 %v521_v53, %v1705_v60 }
 0x80b   :  { %v591_v28 = vpop.permute.xlu2 %590 }
 0x80c   :  { %v593_v29 = vmul.f32 %v591_v28, %v585_v27 }
 0x80e   :  { %595 = vrot.lane.b32.xlu0 %v593_v29, %s1517_s17 }
 0x83b   :  { %v527_v52 = vpop.permute.xlu1 %526 }
 0x83c   :  { %v529_v55 = vmul.f32 %v527_v52, %v521_v53 }
 0x83e   :  { %531 = vrot.lane.b32.xlu0 %v529_v55, %s1517_s17 }
 0x880   :  { %v596_v58 = vpop.permute.xlu0 %595 }
 0x881   :  { %v1734_v59 = vadd.f32 %v596_v58, %v588_v57 }
 0x883   :  { %1361 = vtanh.f32 %v1734_v59 }
 0x889   :  { %v1362_v61 = vpop.eup %1361 }
 0x88a   :  { %601 = vrot.lane.b32.xlu2 %v1362_v61, %s1517_s17 }
 0x8b0   :  { %v532_v33 = vpop.permute.xlu0 %531 }
 0x8b1   :  { %v1739_v63 = vadd.f32 %v532_v33, %v524_v62 }
 0x8b3   :  { %1363 = vtanh.f32 %v1739_v63 }
 0x8b9   :  { %v1364_v4 = vpop.eup %1363 }
 0x8ba   :  { %537 = vrot.lane.b32.xlu2 %v1364_v4, %s1517_s17 }
 0x8e4   :  { %v602_v5 = vpop.permute.xlu2 %601 }
 0x8e5   :  { %v604_v56 = vmul.f32 %v602_v5, %v585_v27 }
 0x8e7   :  { %606 = vst [vmem:[#allocation1] ss:$4 sm:$0xff] %v604_v56 }
 0x8ee   :  { %v607_v45 = vld.sshfl [vmem:[#allocation1] sm:$0xff pattern:$0x73625140] }
 0x8ef   :  { %608 = vrot.lane.b32.xlu0 %v607_v45, %s1523_s0  ;;  %676 = vst [vmem:[#allocation1] ss:$4 sm:$0xff] %v604_v56  ;;  %v132_v45 = vrot.slane %v1759_v3, 2 }
 0x8f6   :  { %v677_v6 = vld.sshfl [vmem:[#allocation1] sm:$0xff pattern:$0x73625140] }
 0x8f7   :  { %678 = vrot.lane.b32.xlu1 %v677_v6, %s1523_s0 }
 0x914   :  { %v538_v7 = vpop.permute.xlu2 %537 }
 0x915   :  { %v540_v60 = vmul.f32 %v538_v7, %v521_v53 }
 0x917   :  { %612 = vrot.lane.b32.xlu1 %v540_v60, %s1524_s1 }
 0x961   :  { %v609_v10 = vpop.permute.xlu0 %608 }
 0x969   :  { %v679_v9 = vpop.permute.xlu1 %678 }
 0x96a   :  { %1279 = vmatmul.msk.f32.vlgmr.msra.gmra.mxu0 %vm141_vm5, %v679_v9 }
 0x989   :  { %v613_v0 = vpop.permute.xlu1 %612 }
 0x98a   :  { %v615_v1 = vsel %vm141_vm5, %v609_v10, %v613_v0 }
 0x98b   :  { %1277 = vmatmul.msk.f32.vlgmr.msrb.gmra.mxu2 %vm210_vm6, %v615_v1 }
 0x98c   :  { %1167 = vmatpush.msrb.mxu2 %v1586_v36 }
 0x98e   :  { %1168 = vmatpush.msrb.mxu2 %v1588_v37 }
 0x990   :  { %1169 = vmatpush.msrb.mxu2 %v1592_v38 }
 0x992   :  { %1170 = vmatpush.msrb.mxu2 %v1597_v39 }
 0x994   :  { %1171 = vmatpush.msrb.mxu2 %v1602_v40 }
 0x996   :  { %1172 = vmatpush.msrb.mxu2 %v1607_v41 }
 0x998   :  { %1173 = vmatpush.msrb.mxu2 %v1612_v42 }
 0x99a   :  { %1174 = vmatpush.msrb.mxu2 %v1623_v47 }
 0x9e7   :  { %v699_v8 = vpop.f32.mrf.mxu0 }
 0x9e8   :  { %v702_v36 = vadd.f32 %v699_v8, %v1759_v3 }
 0x9ea   :  { %1365 = vtanh.f32 %v702_v36  ;;  %v1280_v41 = vmul.f32 -1.442695, %v702_v36 }
 0x9f0   :  { %v1366_v37 = vpop.eup %1365 }
 0x9f1   :  { %725 = vrot.lane.b32.xlu2 %v1366_v37, %s1517_s17 }
 0xa0e   :  { %v636_v38 = vpop.f32.mrf.mxu2 }
 0xa0f   :  { %v637_v39 = vadd.f32 %v1652_v54, %v636_v38 }
 0xa11   :  { %1367 = vtanh.f32 %v637_v39  ;;  %v1278_v22 = vmul.f32 -1.442695, %v637_v39 }
 0xa12   :  { %1369 = vpow2.f32 %v1280_v41 }
 0xa17   :  { %v1368_v40 = vpop.eup %1367 }
 0xa18   :  { %661 = vrot.lane.b32.xlu1 %v1368_v40, %s1517_s17  ;;  %v1370_v42 = vpop.eup %1369 }
 0xa19   :  { %v706_v47 = vadd.f32 1.0, %v1370_v42 }
 0xa1b   :  { %1371 = vrcp.f32 %v706_v47  ;;  %v718_v16 = vand.u32 2147483648, %v706_v47  ;;  %vm712_vm2 = vweird.f32 %v706_v47  ;;  %v716_v17 = vand.u32 2147483647, %v706_v47 }
 0xa1c   :  { %1373 = vpow2.f32 %v1278_v22 }
 0xa1d   :  { %v719_v19 = vor.u32 1.1754944e-38, %v718_v16  ;;  %vm717_vm4 = vcmp.eq.f32.partialorder %v716_v17, 8.507059e+37 }
 0xa21   :  { %v1372_v11 = vpop.eup %1371 }
 0xa22   :  { %v708_v2 = vmul.f32 %v1372_v11, %v706_v47  ;;  %vm713_vm1 = vweird.f32 %v1372_v11  ;;  %v1374_v23 = vpop.eup %1373 }
 0xa23   :  { %vm714_vm3 = vmor %vm712_vm2, %vm713_vm1  ;;  %v642_v24 = vadd.f32 1.0, %v1374_v23 }
 0xa24   :  { %v709_v12 = vsub.f32 1.0, %v708_v2 }
 0xa25   :  { %1375 = vrcp.f32 %v642_v24  ;;  %v654_v30 = vand.u32 2147483648, %v642_v24  ;;  %vm648_vm8 = vweird.f32 %v642_v24  ;;  %v652_v31 = vand.u32 2147483647, %v642_v24 }
 0xa26   :  { %v710_v13 = vmul.f32 %v1372_v11, %v709_v12 }
 0xa27   :  { %v655_v35 = vor.u32 1.1754944e-38, %v654_v30  ;;  %vm653_vm10 = vcmp.eq.f32.partialorder %v652_v31, 8.507059e+37 }
 0xa28   :  { %v711_v15 = vadd.f32 %v1372_v11, %v710_v13 }
 0xa2a   :  { %v715_v18 = vsel %vm714_vm3, %v1372_v11, %v711_v15 }
 0xa2b   :  { %v720_v14 = vsel %vm717_vm4, %v719_v19, %v715_v18  ;;  %v1376_v25 = vpop.eup %1375 }
 0xa2c   :  { %v644_v26 = vmul.f32 %v1376_v25, %v642_v24  ;;  %vm649_vm7 = vweird.f32 %v1376_v25  ;;  %v723_v48 = vmul.f32 %v720_v14, %v1734_v59 }
 0xa2d   :  { %vm650_vm9 = vmor %vm648_vm8, %vm649_vm7 }
 0xa2e   :  { %v645_v27 = vsub.f32 1.0, %v644_v26 }
 0xa30   :  { %v646_v28 = vmul.f32 %v1376_v25, %v645_v27 }
 0xa32   :  { %v647_v29 = vadd.f32 %v1376_v25, %v646_v28 }
 0xa34   :  { %v651_v32 = vsel %vm650_vm9, %v1376_v25, %v647_v29 }
 0xa35   :  { %v656_v44 = vsel %vm653_vm10, %v655_v35, %v651_v32 }
 0xa36   :  { %v659_v51 = vmul.f32 %v656_v44, %v1739_v63 }
 0xa4b   :  { %v726_v20 = vpop.permute.xlu2 %725 }
 0xa4c   :  { %v728_v21 = vmul.f32 %v726_v20, %v720_v14 }
 0xa4e   :  { %730 = vrot.lane.b32.xlu0 %v728_v21, %s1517_s17 }
 0xa8a   :  { %v662_v43 = vpop.permute.xlu1 %661 }
 0xa8b   :  { %v664_v46 = vmul.f32 %v662_v43, %v656_v44 }
 0xa8d   :  { %666 = vrot.lane.b32.xlu0 %v664_v46, %s1517_s17 }
 0xac0   :  { %v731_v49 = vpop.permute.xlu0 %730 }
 0xac1   :  { %v1768_v34 = vadd.f32 %v731_v49, %v723_v48 }
 0xac3   :  { %1377 = vtanh.f32 %v1768_v34 }
 0xac9   :  { %v1378_v50 = vpop.eup %1377 }
 0xaca   :  { %736 = vrot.lane.b32.xlu2 %v1378_v50, %s1517_s17 }
 0xaff   :  { %v667_v52 = vpop.permute.xlu0 %666 }
 0xb00   :  { %v1773_v53 = vadd.f32 %v667_v52, %v659_v51 }
 0xb02   :  { %1379 = vtanh.f32 %v1773_v53 }
 0xb08   :  { %v1380_v55 = vpop.eup %1379 }
 0xb09   :  { %672 = vrot.lane.b32.xlu2 %v1380_v55, %s1517_s17 }
 0xb24   :  { %v737_v57 = vpop.permute.xlu2 %736 }
 0xb25   :  { %v739_v58 = vmul.f32 %v737_v57, %v720_v14 }
 0xb27   :  { %741 = vst [vmem:[#allocation1] ss:$4 sm:$0xff] %v739_v58 }
 0xb2e   :  { %v742_v59 = vld.sshfl [vmem:[#allocation1] sm:$0xff pattern:$0x73625140] }
 0xb2f   :  { %743 = vrot.lane.b32.xlu0 %v742_v59, %s1523_s0  ;;  %811 = vst [vmem:[#allocation1] ss:$4 sm:$0xff] %v739_v58 }
 0xb36   :  { %v812_v61 = vld.sshfl [vmem:[#allocation1] sm:$0xff pattern:$0x73625140] }
 0xb37   :  { %813 = vrot.lane.b32.xlu1 %v812_v61, %s1523_s0  ;;  %v133_v61 = vrot.slane %v1759_v3, 4 }
 0xb63   :  { %v673_v62 = vpop.permute.xlu2 %672 }
 0xb64   :  { %v675_v33 = vmul.f32 %v673_v62, %v656_v44 }
 0xb66   :  { %747 = vrot.lane.b32.xlu1 %v675_v33, %s1524_s1 }
 0xba1   :  { %v744_v4 = vpop.permute.xlu0 %743 }
 0xba9   :  { %v814_v63 = vpop.permute.xlu1 %813 }
 0xbaa   :  { %1283 = vmatmul.msk.f32.vlgmr.msra.gmra.mxu3 %vm141_vm5, %v814_v63 }
 0xbd8   :  { %v748_v5 = vpop.permute.xlu1 %747 }
 0xbd9   :  { %v750_v56 = vsel %vm141_vm5, %v744_v4, %v748_v5 }
 0xbda   :  { %1281 = vmatmul.msk.f32.vlgmr.msrb.gmra.mxu1 %vm210_vm6, %v750_v56 }
 0xc2d   :  { %v834_v6 = vpop.f32.mrf.mxu3 }
 0xc2e   :  { %v837_v7 = vadd.f32 %v834_v6, %v132_v45 }
 0xc30   :  { %1381 = vtanh.f32 %v837_v7  ;;  %v1284_v1 = vmul.f32 -1.442695, %v837_v7 }
 0xc36   :  { %v1382_v60 = vpop.eup %1381 }
 0xc37   :  { %860 = vrot.lane.b32.xlu2 %v1382_v60, %s1517_s17 }
 0xc57   :  { %v771_v9 = vpop.f32.mrf.mxu1 }
 0xc58   :  { %v772_v10 = vadd.f32 %v1652_v54, %v771_v9 }
 0xc5a   :  { %1383 = vtanh.f32 %v772_v10  ;;  %v1282_v16 = vmul.f32 -1.442695, %v772_v10 }
 0xc5b   :  { %1385 = vpow2.f32 %v1284_v1 }
 0xc60   :  { %v1384_v0 = vpop.eup %1383 }
 0xc61   :  { %796 = vrot.lane.b32.xlu0 %v1384_v0, %s1517_s17  ;;  %v1386_v8 = vpop.eup %1385 }
 0xc62   :  { %v841_v36 = vadd.f32 1.0, %v1386_v8 }
 0xc64   :  { %1387 = vrcp.f32 %v841_v36  ;;  %v853_v42 = vand.u32 2147483648, %v841_v36  ;;  %vm847_vm12 = vweird.f32 %v841_v36  ;;  %v851_v47 = vand.u32 2147483647, %v841_v36 }
 0xc65   :  { %1389 = vpow2.f32 %v1282_v16 }
 0xc66   :  { %v854_v2 = vor.u32 1.1754944e-38, %v853_v42  ;;  %vm852_vm14 = vcmp.eq.f32.partialorder %v851_v47, 8.507059e+37 }
 0xc6a   :  { %v1388_v37 = vpop.eup %1387 }
 0xc6b   :  { %v843_v38 = vmul.f32 %v1388_v37, %v841_v36  ;;  %vm848_vm11 = vweird.f32 %v1388_v37  ;;  %v1390_v17 = vpop.eup %1389 }
 0xc6c   :  { %vm849_vm13 = vmor %vm847_vm12, %vm848_vm11  ;;  %v777_v18 = vadd.f32 1.0, %v1390_v17 }
 0xc6d   :  { %v844_v39 = vsub.f32 1.0, %v843_v38 }
 0xc6e   :  { %1391 = vrcp.f32 %v777_v18  ;;  %v789_v23 = vand.u32 2147483648, %v777_v18  ;;  %vm783_vm0 = vweird.f32 %v777_v18  ;;  %v787_v24 = vand.u32 2147483647, %v777_v18 }
 0xc6f   :  { %v845_v40 = vmul.f32 %v1388_v37, %v844_v39 }
 0xc70   :  { %v790_v26 = vor.u32 1.1754944e-38, %v789_v23  ;;  %vm788_vm2 = vcmp.eq.f32.partialorder %v787_v24, 8.507059e+37 }
 0xc71   :  { %v846_v41 = vadd.f32 %v1388_v37, %v845_v40 }
 0xc73   :  { %v850_v11 = vsel %vm849_vm13, %v1388_v37, %v846_v41 }
 0xc74   :  { %v855_v12 = vsel %vm852_vm14, %v854_v2, %v850_v11  ;;  %v1392_v19 = vpop.eup %1391 }
 0xc75   :  { %v779_v14 = vmul.f32 %v1392_v19, %v777_v18  ;;  %vm784_vm15 = vweird.f32 %v1392_v19  ;;  %v858_v30 = vmul.f32 %v855_v12, %v1768_v34 }
 0xc76   :  { %vm785_vm1 = vmor %vm783_vm0, %vm784_vm15 }
 0xc77   :  { %v780_v20 = vsub.f32 1.0, %v779_v14 }
 0xc79   :  { %v781_v21 = vmul.f32 %v1392_v19, %v780_v20 }
 0xc7b   :  { %v782_v22 = vadd.f32 %v1392_v19, %v781_v21 }
 0xc7d   :  { %v786_v25 = vsel %vm785_vm1, %v1392_v19, %v782_v22 }
 0xc7e   :  { %v791_v28 = vsel %vm788_vm2, %v790_v26, %v786_v25 }
 0xc7f   :  { %v794_v43 = vmul.f32 %v791_v28, %v1773_v53 }
 0xc91   :  { %v861_v13 = vpop.permute.xlu2 %860 }
 0xc92   :  { %v863_v15 = vmul.f32 %v861_v13, %v855_v12 }
 0xc94   :  { %865 = vrot.lane.b32.xlu1 %v863_v15, %s1517_s17 }
 0xcd3   :  { %v797_v27 = vpop.permute.xlu0 %796 }
 0xcd4   :  { %v799_v29 = vmul.f32 %v797_v27, %v791_v28 }
 0xcd6   :  { %801 = vrot.lane.b32.xlu2 %v799_v29, %s1517_s17 }
 0xd06   :  { %v866_v31 = vpop.permute.xlu1 %865 }
 0xd07   :  { %v1790_v32 = vadd.f32 %v866_v31, %v858_v30 }
 0xd09   :  { %1393 = vtanh.f32 %v1790_v32 }
 0xd0f   :  { %v1394_v35 = vpop.eup %1393 }
 0xd10   :  { %871 = vrot.lane.b32.xlu0 %v1394_v35, %s1517_s17 }
 0xd30   :  { %v802_v44 = vpop.permute.xlu2 %801 }
 0xd31   :  { %v1795_v46 = vadd.f32 %v802_v44, %v794_v43 }
 0xd33   :  { %1395 = vtanh.f32 %v1795_v46 }
 0xd39   :  { %v1396_v48 = vpop.eup %1395 }
 0xd3a   :  { %807 = vrot.lane.b32.xlu1 %v1396_v48, %s1517_s17 }
 0xd82   :  { %v872_v49 = vpop.permute.xlu0 %871 }
 0xd83   :  { %v874_v34 = vmul.f32 %v872_v49, %v855_v12 }
 0xd85   :  { %876 = vst [vmem:[#allocation1] ss:$4 sm:$0xff] %v874_v34 }
 0xd8c   :  { %v877_v50 = vld.sshfl [vmem:[#allocation1] sm:$0xff pattern:$0x73625140] }
 0xd8d   :  { %878 = vrot.lane.b32.xlu0 %v877_v50, %s1523_s0  ;;  %946 = vst [vmem:[#allocation1] ss:$4 sm:$0xff] %v874_v34  ;;  %v134_v50 = vrot.slane %v1759_v3, 6 }
 0xd94   :  { %v947_v51 = vld.sshfl [vmem:[#allocation1] sm:$0xff pattern:$0x73625140] }
 0xd95   :  { %948 = vrot.lane.b32.xlu2 %v947_v51, %s1523_s0 }
 0xdac   :  { %v808_v52 = vpop.permute.xlu1 %807 }
 0xdad   :  { %v810_v53 = vmul.f32 %v808_v52, %v791_v28 }
 0xdaf   :  { %882 = vrot.lane.b32.xlu1 %v810_v53, %s1524_s1 }
 0xdef   :  { %v949_v55 = vpop.permute.xlu2 %948 }
 0xdf0   :  { %1287 = vmatmul.msk.f32.vlgmr.msra.gmra.mxu2 %vm141_vm5, %v949_v55 }
 0xdff   :  { %v879_v57 = vpop.permute.xlu0 %878 }
 0xe21   :  { %v883_v58 = vpop.permute.xlu1 %882 }
 0xe22   :  { %v885_v59 = vsel %vm141_vm5, %v879_v57, %v883_v58  ;;  %v1829_v58 = vld [vmem:[#allocation5 + $0x70] ss:$0 sm:$0xff] }
 0xe23   :  { %1285 = vmatmul.msk.f32.vlgmr.msrb.gmra.mxu0 %vm210_vm6, %v885_v59 }
 0xe73   :  { %v969_v62 = vpop.f32.mrf.mxu2 }
 0xe74   :  { %v972_v33 = vadd.f32 %v969_v62, %v133_v61 }
 0xe76   :  { %1397 = vtanh.f32 %v972_v33  ;;  %v1288_v45 = vmul.f32 -1.442695, %v972_v33 }
 0xe7c   :  { %v1398_v63 = vpop.eup %1397 }
 0xe7d   :  { %995 = vrot.lane.b32.xlu2 %v1398_v63, %s1517_s17 }
 0xea0   :  { %v906_v4 = vpop.f32.mrf.mxu0 }
 0xea1   :  { %v907_v5 = vadd.f32 %v1652_v54, %v906_v4 }
 0xea3   :  { %1399 = vtanh.f32 %v907_v5  ;;  %v1286_v41 = vmul.f32 -1.442695, %v907_v5 }
 0xea4   :  { %1401 = vpow2.f32 %v1288_v45 }
 0xea9   :  { %v1400_v56 = vpop.eup %1399 }
 0xeaa   :  { %931 = vrot.lane.b32.xlu0 %v1400_v56, %s1517_s17  ;;  %v1402_v6 = vpop.eup %1401 }
 0xeab   :  { %v976_v7 = vadd.f32 1.0, %v1402_v6 }
 0xead   :  { %1403 = vrcp.f32 %v976_v7  ;;  %v988_v8 = vand.u32 2147483648, %v976_v7  ;;  %vm982_vm4 = vweird.f32 %v976_v7  ;;  %v986_v36 = vand.u32 2147483647, %v976_v7 }
 0xeae   :  { %1405 = vpow2.f32 %v1286_v41 }
 0xeaf   :  { %v989_v37 = vor.u32 1.1754944e-38, %v988_v8  ;;  %vm987_vm8 = vcmp.eq.f32.partialorder %v986_v36, 8.507059e+37 }
 0xeb3   :  { %v1404_v60 = vpop.eup %1403 }
 0xeb4   :  { %v978_v9 = vmul.f32 %v1404_v60, %v976_v7  ;;  %vm983_vm3 = vweird.f32 %v1404_v60  ;;  %v1406_v42 = vpop.eup %1405 }
 0xeb5   :  { %vm984_vm7 = vmor %vm982_vm4, %vm983_vm3  ;;  %v912_v47 = vadd.f32 1.0, %v1406_v42 }
 0xeb6   :  { %v979_v10 = vsub.f32 1.0, %v978_v9 }
 0xeb7   :  { %1407 = vrcp.f32 %v912_v47  ;;  %v924_v16 = vand.u32 2147483648, %v912_v47  ;;  %vm918_vm10 = vweird.f32 %v912_v47  ;;  %v922_v17 = vand.u32 2147483647, %v912_v47 }
 0xeb8   :  { %v980_v0 = vmul.f32 %v1404_v60, %v979_v10 }
 0xeb9   :  { %v925_v19 = vor.u32 1.1754944e-38, %v924_v16  ;;  %vm923_vm12 = vcmp.eq.f32.partialorder %v922_v17, 8.507059e+37 }
 0xeba   :  { %v981_v1 = vadd.f32 %v1404_v60, %v980_v0 }
 0xebc   :  { %v985_v54 = vsel %vm984_vm7, %v1404_v60, %v981_v1 }
 0xebd   :  { %v990_v39 = vsel %vm987_vm8, %v989_v37, %v985_v54  ;;  %v1408_v11 = vpop.eup %1407 }
 0xebe   :  { %v914_v2 = vmul.f32 %v1408_v11, %v912_v47  ;;  %vm919_vm9 = vweird.f32 %v1408_v11  ;;  %v993_v22 = vmul.f32 %v990_v39, %v1790_v32 }
 0xebf   :  { %vm920_vm11 = vmor %vm918_vm10, %vm919_vm9  ;;  %vm1242_vm10 = vcmask 25600  }
 0xec0   :  { %v915_v12 = vsub.f32 1.0, %v914_v2 }
 0xec2   :  { %v916_v13 = vmul.f32 %v1408_v11, %v915_v12 }
 0xec4   :  { %v917_v15 = vadd.f32 %v1408_v11, %v916_v13 }
 0xec6   :  { %v921_v18 = vsel %vm920_vm11, %v1408_v11, %v917_v15 }
 0xec7   :  { %v926_v20 = vsel %vm923_vm12, %v925_v19, %v921_v18 }
 0xec8   :  { %v929_v26 = vmul.f32 %v926_v20, %v1795_v46 }
 0xed7   :  { %v996_v38 = vpop.permute.xlu2 %995 }
 0xed8   :  { %v998_v40 = vmul.f32 %v996_v38, %v990_v39 }
 0xeda   :  { %1000 = vrot.lane.b32.xlu1 %v998_v40, %s1517_s17 }
 0xf1c   :  { %v932_v14 = vpop.permute.xlu0 %931 }
 0xf1d   :  { %v934_v21 = vmul.f32 %v932_v14, %v926_v20 }
 0xf1f   :  { %936 = vrot.lane.b32.xlu2 %v934_v21, %s1517_s17 }
 0xf4c   :  { %v1001_v23 = vpop.permute.xlu1 %1000 }
 0xf4d   :  { %v1812_v24 = vadd.f32 %v1001_v23, %v993_v22 }
 0xf4f   :  { %1409 = vtanh.f32 %v1812_v24 }
 0xf55   :  { %v1410_v25 = vpop.eup %1409 }
 0xf56   :  { %1006 = vrot.lane.b32.xlu0 %v1410_v25, %s1517_s17 }
 0xf79   :  { %v937_v27 = vpop.permute.xlu2 %936 }
 0xf7a   :  { %v1817_v28 = vadd.f32 %v937_v27, %v929_v26 }
 0xf7c   :  { %1411 = vtanh.f32 %v1817_v28 }
 0xf82   :  { %v1412_v29 = vpop.eup %1411 }
 0xf83   :  { %942 = vrot.lane.b32.xlu1 %v1412_v29, %s1517_s17 }
 0xfc8   :  { %v1007_v30 = vpop.permute.xlu0 %1006 }
 0xfc9   :  { %v1009_v31 = vmul.f32 %v1007_v30, %v990_v39 }
 0xfcb   :  { %1011 = vst [vmem:[#allocation1] ss:$4 sm:$0xff] %v1009_v31 }
 0xfd2   :  { %v1012_v32 = vld.sshfl [vmem:[#allocation1] sm:$0xff pattern:$0x73625140] }
 0xfd3   :  { %1013 = vrot.lane.b32.xlu0 %v1012_v32, %s1523_s0  ;;  %1081 = vst [vmem:[#allocation1] ss:$4 sm:$0xff] %v1009_v31 }
 0xfda   :  { %v1082_v35 = vld.sshfl [vmem:[#allocation1] sm:$0xff pattern:$0x73625140] }
 0xfdb   :  { %1083 = vrot.lane.b32.xlu2 %v1082_v35, %s1523_s0 }
 0xff5   :  { %v943_v43 = vpop.permute.xlu1 %942 }
 0xff6   :  { %v945_v44 = vmul.f32 %v943_v43, %v926_v20 }
 0xff8   :  { %1017 = vrot.lane.b32.xlu1 %v945_v44, %s1524_s1 }
0x1035   :  { %v1084_v46 = vpop.permute.xlu2 %1083 }
0x1036   :  { %1291 = vmatmul.msk.f32.vlgmr.msra.gmra.mxu1 %vm141_vm5, %v1084_v46 }
0x1045   :  { %v1014_v48 = vpop.permute.xlu0 %1013 }
0x106a   :  { %v1018_v49 = vpop.permute.xlu1 %1017 }
0x106b   :  { %v1020_v34 = vsel %vm141_vm5, %v1014_v48, %v1018_v49 }
0x106c   :  { %1289 = vmatmul.msk.f32.vlgmr.msrb.gmra.mxu3 %vm210_vm6, %v1020_v34 }
0x10b3   :  { %v1104_v51 = vpop.f32.mrf.mxu1 }
0x10b4   :  { %v1107_v52 = vadd.f32 %v1104_v51, %v134_v50 }
0x10b6   :  { %1413 = vtanh.f32 %v1107_v52  ;;  %v1292_v55 = vmul.f32 -1.442695, %v1107_v52 }
0x10b8   :  { %1415 = vpow2.f32 %v1292_v55 }
0x10bc   :  { %v1414_v53 = vpop.eup %1413 }
0x10bd   :  { %1130 = vrot.lane.b32.xlu2 %v1414_v53, %s1517_s17 }
0x10be   :  { %v1416_v61 = vpop.eup %1415 }
0x10bf   :  { %v1111_v62 = vadd.f32 1.0, %v1416_v61 }
0x10c1   :  { %v1123_v45 = vand.u32 2147483648, %v1111_v62  ;;  %vm1117_vm14 = vweird.f32 %v1111_v62  ;;  %v1121_v6 = vand.u32 2147483647, %v1111_v62 }
0x10c3   :  { %v1124_v60 = vor.u32 1.1754944e-38, %v1123_v45  ;;  %vm1122_vm0 = vcmp.eq.f32.partialorder %v1121_v6, 8.507059e+37 }
0x10ef   :  { %v1041_v57 = vpop.f32.mrf.mxu3 }
0x10f0   :  { %v1042_v59 = vadd.f32 %v1829_v58, %v1041_v57 }
0x10f2   :  { %1417 = vtanh.f32 %v1042_v59  ;;  %v1290_v1 = vmul.f32 -1.442695, %v1042_v59 }
0x10f3   :  { %1419 = vrcp.f32 %v1111_v62 }
0x10f4   :  { %1421 = vpow2.f32 %v1290_v1 }
0x10f8   :  { %v1418_v33 = vpop.eup %1417 }
0x10f9   :  { %1066 = vrot.lane.b32.xlu0 %v1418_v33, %s1517_s17  ;;  %v1420_v3 = vpop.eup %1419 }
0x10fa   :  { %v1113_v63 = vmul.f32 %v1420_v3, %v1111_v62  ;;  %vm1118_vm13 = vweird.f32 %v1420_v3  ;;  %v1422_v8 = vpop.eup %1421 }
0x10fb   :  { %vm1119_vm15 = vmor %vm1117_vm14, %vm1118_vm13  ;;  %v1047_v36 = vadd.f32 1.0, %v1422_v8 }
0x10fc   :  { %v1114_v4 = vsub.f32 1.0, %v1113_v63  ;;  %v63_v63 = vld [vmem:[#allocation5 + $0x90] sm:$0xff] }
0x10fd   :  { %1423 = vrcp.f32 %v1047_v36  ;;  %v1059_v41 = vand.u32 2147483648, %v1047_v36  ;;  %vm1053_vm2 = vweird.f32 %v1047_v36  ;;  %v1057_v42 = vand.u32 2147483647, %v1047_v36  ;;  %1234 = vmatpush.msra.mxu0 %v63_v63 }
0x10fe   :  { %v1115_v5 = vmul.f32 %v1420_v3, %v1114_v4  ;;  %v62_v4 = vld [vmem:[#allocation5 + $0x88] sm:$0xff] }
0x10ff   :  { %v1060_v11 = vor.u32 1.1754944e-38, %v1059_v41  ;;  %vm1058_vm4 = vcmp.eq.f32.partialorder %v1057_v42, 8.507059e+37  ;;  %1235 = vmatpush.msra.mxu0 %v62_v4 }
0x1100   :  { %v1116_v56 = vadd.f32 %v1420_v3, %v1115_v5  ;;  %v61_v5 = vld [vmem:[#allocation5 + $0x80] sm:$0xff] }
0x1101   :  { %1236 = vmatpush.msra.mxu0 %v61_v5 }
0x1102   :  { %v1120_v7 = vsel %vm1119_vm15, %v1420_v3, %v1116_v56  ;;  %v60_v56 = vld [vmem:[#allocation5 + $0x78] sm:$0xff] }
0x1103   :  { %v1125_v10 = vsel %vm1122_vm0, %v1124_v60, %v1120_v7  ;;  %v1424_v54 = vpop.eup %1423  ;;  %1237 = vmatpush.msra.mxu0 %v60_v56  ;;  %v1308_v60 = vld [vmem:[#allocation5 + $0x98] ss:$0 sm:$0xff] }
0x1104   :  { %v1049_v37 = vmul.f32 %v1424_v54, %v1047_v36  ;;  %vm1054_vm1 = vweird.f32 %v1424_v54  ;;  %v1128_v15 = vmul.f32 %v1125_v10, %v1812_v24 }
0x1105   :  { %vm1055_vm3 = vmor %vm1053_vm2, %vm1054_vm1 }
0x1106   :  { %v1050_v38 = vsub.f32 1.0, %v1049_v37 }
0x1108   :  { %v1051_v39 = vmul.f32 %v1424_v54, %v1050_v38 }
0x110a   :  { %v1052_v40 = vadd.f32 %v1424_v54, %v1051_v39 }
0x110c   :  { %v1056_v47 = vsel %vm1055_vm3, %v1424_v54, %v1052_v40 }
0x110d   :  { %v1061_v12 = vsel %vm1058_vm4, %v1060_v11, %v1056_v47 }
0x110e   :  { %v1064_v19 = vmul.f32 %v1061_v12, %v1817_v28 }
0x1117   :  { %v1131_v9 = vpop.permute.xlu2 %1130 }
0x1118   :  { %v1133_v0 = vmul.f32 %v1131_v9, %v1125_v10 }
0x111a   :  { %1135 = vrot.lane.b32.xlu1 %v1133_v0, %s1517_s17 }
0x116b   :  { %v1067_v2 = vpop.permute.xlu0 %1066 }
0x116c   :  { %v1069_v13 = vmul.f32 %v1067_v2, %v1061_v12 }
0x116e   :  { %1071 = vrot.lane.b32.xlu2 %v1069_v13, %s1517_s17 }
0x118c   :  { %v1136_v16 = vpop.permute.xlu1 %1135 }
0x118d   :  { %v1138_v17 = vadd.f32 %v1136_v16, %v1128_v15 }
0x118f   :  { %1425 = vtanh.f32 %v1138_v17 }
0x1195   :  { %v1426_v18 = vpop.eup %1425 }
0x1196   :  { %1141 = vrot.lane.b32.xlu0 %v1426_v18, %s1517_s17 }
0x11c8   :  { %v1072_v14 = vpop.permute.xlu2 %1071 }
0x11c9   :  { %v1074_v20 = vadd.f32 %v1072_v14, %v1064_v19 }
0x11cb   :  { %1427 = vtanh.f32 %v1074_v20 }
0x11d1   :  { %v1428_v21 = vpop.eup %1427 }
0x11d2   :  { %1077 = vrot.lane.b32.xlu1 %v1428_v21, %s1517_s17 }
0x1208   :  { %v1142_v22 = vpop.permute.xlu0 %1141 }
0x1209   :  { %v1144_v23 = vmul.f32 %v1142_v22, %v1125_v10 }
0x120b   :  { %1146 = vst [vmem:[#allocation1] ss:$4 sm:$0xff] %v1144_v23 }
0x1212   :  { %v1147_v25 = vld.sshfl [vmem:[#allocation1] sm:$0xff pattern:$0x73625140] }
0x1213   :  { %1148 = vrot.lane.b32.xlu2 %v1147_v25, %s1523_s0 }
0x1244   :  { %v1078_v24 = vpop.permute.xlu1 %1077 }
0x1245   :  { %v1080_v26 = vmul.f32 %v1078_v24, %v1061_v12 }
0x1247   :  { %1152 = vrot.lane.b32.xlu0 %v1080_v26, %s1524_s1 }
0x126d   :  { %v1149_v27 = vpop.permute.xlu2 %1148 }
0x12b9   :  { %v1153_v29 = vpop.permute.xlu0 %1152 }
0x12ba   :  { %v1155_v28 = vsel %vm141_vm5, %v1149_v27, %v1153_v29 }
0x12bb   :  { %1293 = vmatmul.msk.f32.vlgmr.msrb.gmra.mxu2 %vm210_vm6, %v1155_v28 }
0x133e   :  { %v1176_v30 = vpop.f32.mrf.mxu2 }
0x133f   :  { %v1177_v31 = vadd.f32 %v1829_v58, %v1176_v30 }
0x1341   :  { %1429 = vtanh.f32 %v1177_v31  ;;  %v1294_v35 = vmul.f32 -1.442695, %v1177_v31 }
0x1343   :  { %1431 = vpow2.f32 %v1294_v35 }
0x1347   :  { %v1430_v32 = vpop.eup %1429 }
0x1348   :  { %1201 = vrot.lane.b32.xlu1 %v1430_v32, %s1517_s17 }
0x1349   :  { %v1432_v43 = vpop.eup %1431 }
0x134a   :  { %v1182_v44 = vadd.f32 1.0, %v1432_v43 }
0x134c   :  { %1433 = vrcp.f32 %v1182_v44  ;;  %v1194_v51 = vand.u32 2147483648, %v1182_v44  ;;  %vm1188_vm6 = vweird.f32 %v1182_v44  ;;  %v1192_v52 = vand.u32 2147483647, %v1182_v44 }
0x134e   :  { %v1195_v55 = vor.u32 1.1754944e-38, %v1194_v51  ;;  %vm1193_vm9 = vcmp.eq.f32.partialorder %v1192_v52, 8.507059e+37 }
0x1352   :  { %v1434_v46 = vpop.eup %1433 }
0x1353   :  { %v1184_v48 = vmul.f32 %v1434_v46, %v1182_v44  ;;  %vm1189_vm7 = vweird.f32 %v1434_v46 }
0x1354   :  { %vm1190_vm8 = vmor %vm1188_vm6, %vm1189_vm7 }
0x1355   :  { %v1185_v49 = vsub.f32 1.0, %v1184_v48 }
0x1357   :  { %v1186_v34 = vmul.f32 %v1434_v46, %v1185_v49 }
0x1359   :  { %v1187_v50 = vadd.f32 %v1434_v46, %v1186_v34 }
0x135b   :  { %v1191_v53 = vsel %vm1190_vm8, %v1434_v46, %v1187_v50 }
0x135c   :  { %v1196_v58 = vsel %vm1193_vm9, %v1195_v55, %v1191_v53 }
0x135d   :  { %v1199_v61 = vmul.f32 %v1196_v58, %v1074_v20 }
0x13ba   :  { %v1202_v57 = vpop.permute.xlu1 %1201 }
0x13bb   :  { %v1204_v59 = vmul.f32 %v1202_v57, %v1196_v58 }
0x13bd   :  { %1206 = vrot.lane.b32.xlu2 %v1204_v59, %s1517_s17 }
0x1417   :  { %v1207_v62 = vpop.permute.xlu2 %1206 }
0x1418   :  { %v1209_v33 = vadd.f32 %v1207_v62, %v1199_v61 }
0x141a   :  { %1435 = vtanh.f32 %v1209_v33 }
0x1420   :  { %v1436_v3 = vpop.eup %1435 }
0x1421   :  { %1212 = vrot.lane.b32.xlu0 %v1436_v3, %s1517_s17 }
0x1493   :  { %v1213_v45 = vpop.permute.xlu0 %1212 }
0x1494   :  { %v1215_v6 = vmul.f32 %v1213_v45, %v1196_v58 }
0x1496   :  { %1218 = vrot.lane.b32.xlu1 %v1215_v6, %s1523_s0 }
0x1508   :  { %v1219_v7 = vpop.permute.xlu1 %1218 }
0x1509   :  { %1295 = vmatmul.msk.f32.vlgmr.msra.gmra.mxu0 %vm141_vm5, %v1219_v7 }
0x1586   :  { %v1239_v9 = vpop.f32.mrf.mxu0 }
0x1587   :  { %v1240_v10 = vadd.f32 %v1308_v60, %v1239_v9 }
0x1589   :  { %1243 = vst.msk [vmem:[#allocation7] sm:$0x3] %vm1242_vm10, %v1240_v10 }
0x158a   :  { %1254 = dma.vmem_to_hbm [thread:$0]  %s1250_s24, 32, %s1252_s27, [#allocation4]  }
0x158b   :  { %1514 = dma.done.wait [#allocation4], 32  }
0x158c   :  { %1515 = vsyncadd [#allocation4], 4294967264 }
0x158d   :  { %1259 = vsyncpa [#allocation3], 1 }
0x158e   :  { %1260 = vsyncpa [#allocation6], 1 }
0x158f   :  { %1261 = vsyncpa [#allocation4], 1 }

</bundles_post_ra>
